<compile_context>
chip_gen: v7x
topology: tpu7x:2x2x1
jax: 0.10.0
libtpu: 0.0.40
codegen_flags: <defaults>
</compile_context>

<pallas_src>
import jax
import jax.numpy as jnp
from jax.experimental import pallas as pl
from jax.experimental.pallas import tpu as pltpu

L_EMBED = 6
IN_DIM = 3 + 3 * 2 * L_EMBED          # 39
HIDDEN = 128
OUT_DIM = 4
_LANE = 128


def _round_up(x, m):
    return (x + m - 1) // m * m


def nerf_mlp_kernel(x_ref, w1_ref, b1_ref, w2_ref, b2_ref, w3_ref, b3_ref,
                    o_ref):
    """Fused 3-layer MLP for one tile of rows, fully resident in VMEM.

    Matmuls run on the MXU in bf16 with f32 accumulation; bias adds and ReLUs
    are done in f32 on the VPU (v5e-safe). Weights (~45 KiB in bf16) stay
    resident across the whole row stream.
    """
    x = x_ref[...]                                                    # (tm, 39) bf16
    h = jnp.dot(x, w1_ref[...], preferred_element_type=jnp.float32)  # (tm, 128) f32
    h = jnp.maximum(h + b1_ref[...], 0.0)
    h = jnp.dot(h.astype(jnp.bfloat16), w2_ref[...],
                preferred_element_type=jnp.float32)                  # (tm, 128) f32
    h = jnp.maximum(h + b2_ref[...], 0.0)
    o = jnp.dot(h.astype(jnp.bfloat16), w3_ref[...],
                preferred_element_type=jnp.float32)                  # (tm, 4) f32
    o_ref[...] = (o + b3_ref[...]).astype(o_ref.dtype)


def _estimate_vmem_bytes(tile_m):
    # Lane dim pads to 128 inside VMEM; x/out tiles are double-buffered.
    x_buf = tile_m * _LANE * 2            # bf16 x tile (39 -> 128 lanes)
    out_buf = tile_m * _LANE * 4          # f32 out tile (4 -> 128 lanes)
    weights = 3 * _LANE * _LANE * 2 + 3 * _LANE * 4
    hidden = 2 * tile_m * _LANE * 4 + tile_m * _LANE * 2   # f32 h + bf16 recast
    return 2 * (x_buf + out_buf) + 2 * weights + hidden


def nerf_forward(x, params, *, tile_m=2048):
    """x: [N, 39] float32 (any N). Returns [N, 4] float32."""
    w1, b1, w2, b2, w3, b3 = params
    N, d_in = x.shape
    assert d_in == IN_DIM

    # Row tile: multiple of 128, as large as tile_m, but small enough that the
    # grid has >= 2 parallel steps (v7x has 2 TensorCores to feed).
    tm = min(tile_m, max(_LANE, _round_up(pl.cdiv(N, 2), _LANE)))
    n_pad = _round_up(N, tm)
    if n_pad != N:
        x = jnp.pad(x, ((0, n_pad - N), (0, 0)))
    grid = (n_pad // tm,)

    # bf16 inputs/weights for the MXU (halves HBM read traffic, 2x MXU rate);
    # biases stay f32 and all post-matmul math is f32.
    x_bf = x.astype(jnp.bfloat16)
    w1, w2, w3 = (w.astype(jnp.bfloat16) for w in (w1, w2, w3))

    full = lambda shape: pl.BlockSpec(shape, lambda i: (0, 0))

    vmem_limit = None
    est = _estimate_vmem_bytes(tm)
    if est > 14 * 1024 * 1024:            # above the conservative v5e default
        vmem_limit = min(_round_up(est, 1 << 20) + (4 << 20), 48 * 1024 * 1024)

    flops = 2 * n_pad * (IN_DIM * HIDDEN + HIDDEN * HIDDEN + HIDDEN * OUT_DIM)
    bytes_accessed = (n_pad * IN_DIM * 2 + n_pad * OUT_DIM * 4 +
                      (IN_DIM * HIDDEN + HIDDEN * HIDDEN + HIDDEN * OUT_DIM) * 2 +
                      (2 * HIDDEN + OUT_DIM) * 4)

    out = pl.pallas_call(
        nerf_mlp_kernel,
        out_shape=jax.ShapeDtypeStruct((n_pad, OUT_DIM), jnp.float32),
        grid_spec=pltpu.PrefetchScalarGridSpec(
            num_scalar_prefetch=0,
            grid=grid,
            in_specs=[
                pl.BlockSpec((tm, IN_DIM), lambda i: (i, 0)),   # x tile
                full((IN_DIM, HIDDEN)),                         # w1 (bf16)
                full((1, HIDDEN)),                              # b1 (f32)
                full((HIDDEN, HIDDEN)),                         # w2 (bf16)
                full((1, HIDDEN)),                              # b2 (f32)
                full((HIDDEN, OUT_DIM)),                        # w3 (bf16)
                full((1, OUT_DIM)),                             # b3 (f32)
            ],
            out_specs=pl.BlockSpec((tm, OUT_DIM), lambda i: (i, 0)),
        ),
        compiler_params=pltpu.CompilerParams(
            dimension_semantics=("parallel",),
            vmem_limit_bytes=vmem_limit),
        cost_estimate=pl.CostEstimate(flops=flops, transcendentals=0,
                                      bytes_accessed=bytes_accessed),
    )(x_bf, w1, b1, w2, b2, w3, b3)

    return out[:N] if n_pad != N else out


def init_params(key):
    """Deterministic synthetic parameters (torch-Linear-like uniform init)."""
    ks = jax.random.split(key, 6)

    def linear(kw, kb, fan_in, fan_out):
        bound = 1.0 / jnp.sqrt(fan_in)
        w = jax.random.uniform(kw, (fan_in, fan_out), jnp.float32,
                               -bound, bound)
        b = jax.random.uniform(kb, (1, fan_out), jnp.float32, -bound, bound)
        return w, b

    w1, b1 = linear(ks[0], ks[1], IN_DIM, HIDDEN)
    w2, b2 = linear(ks[2], ks[3], HIDDEN, HIDDEN)
    w3, b3 = linear(ks[4], ks[5], HIDDEN, OUT_DIM)
    return (w1, b1, w2, b2, w3, b3)


def nerf_reference(x, params):
    """Pure-JAX f32 reference for correctness check."""
    w1, b1, w2, b2, w3, b3 = params
    h = jnp.maximum(x @ w1 + b1, 0.0)
    h = jnp.maximum(h @ w2 + b2, 0.0)
    return h @ w3 + b3


if __name__ == "__main__":
    key = jax.random.PRNGKey(0)
    k_params, k_x = jax.random.split(key)

    params = init_params(k_params)
    # Small batch of sample points; not a tile multiple on purpose so the
    # padding path and the >=2-step grid selection both get exercised.
    N = 1000
    x = jax.random.normal(k_x, (N, IN_DIM), dtype=jnp.float32)

    out = jax.block_until_ready(nerf_forward(x, params))
    ref = jax.block_until_ready(nerf_reference(x, params))

    assert out.shape == (N, OUT_DIM)
    # bf16 weights/activations with f32 accumulation -> loosened tolerance.
    assert bool(jnp.allclose(out, ref, atol=3e-2, rtol=3e-2)), \
        "mismatch vs reference"

    print("KERNEL_OK")
</pallas_src>

<mosaic_0001>
module attributes {stable_mosaic.version = 11 : i64} {
  func.func @nerf_mlp_kernel(%arg0: i32, %arg1: memref<512x39xbf16, #tpu.memory_space<vmem>>, %arg2: memref<39x128xbf16, #tpu.memory_space<vmem>>, %arg3: memref<1x128xf32, #tpu.memory_space<vmem>>, %arg4: memref<128x128xbf16, #tpu.memory_space<vmem>>, %arg5: memref<1x128xf32, #tpu.memory_space<vmem>>, %arg6: memref<128x4xbf16, #tpu.memory_space<vmem>>, %arg7: memref<1x4xf32, #tpu.memory_space<vmem>>, %arg8: memref<512x4xf32, #tpu.memory_space<vmem>>) attributes {dimension_semantics = [#tpu.dimension_semantics<parallel>], iteration_bounds = array<i64: 2>, scalar_prefetch = 0 : i64, scratch_operands = 0 : i64, tpu.core_type = #tpu.core_type<tc>, window_params = [{transform_indices = @transform_0, window_bounds = array<i64: 512, 39>}, {pipeline_mode = #tpu.pipeline_mode<synchronous>, transform_indices = @transform_1, window_bounds = array<i64: 39, 128>}, {pipeline_mode = #tpu.pipeline_mode<synchronous>, transform_indices = @transform_2, window_bounds = array<i64: 1, 128>}, {pipeline_mode = #tpu.pipeline_mode<synchronous>, transform_indices = @transform_3, window_bounds = array<i64: 128, 128>}, {pipeline_mode = #tpu.pipeline_mode<synchronous>, transform_indices = @transform_4, window_bounds = array<i64: 1, 128>}, {pipeline_mode = #tpu.pipeline_mode<synchronous>, transform_indices = @transform_5, window_bounds = array<i64: 128, 4>}, {pipeline_mode = #tpu.pipeline_mode<synchronous>, transform_indices = @transform_6, window_bounds = array<i64: 1, 4>}, {transform_indices = @transform_7, window_bounds = array<i64: 512, 4>}]} {
    %c0 = arith.constant 0 : index
    %c0_0 = arith.constant 0 : index
    %0 = vector.load %arg1[%c0, %c0_0] : memref<512x39xbf16, #tpu.memory_space<vmem>>, vector<512x39xbf16>
    %c0_1 = arith.constant 0 : index
    %c0_2 = arith.constant 0 : index
    %1 = vector.load %arg2[%c0_1, %c0_2] : memref<39x128xbf16, #tpu.memory_space<vmem>>, vector<39x128xbf16>
    %cst = arith.constant dense<0.000000e+00> : vector<512x128xf32>
    %2 = tpu.matmul %0, %1, %cst {dimension_numbers = #tpu.dot_dimension_numbers<[1], [0], [0], [1], [0, 0, 1, 1], [], []>} : vector<512x39xbf16>, vector<39x128xbf16>, vector<512x128xf32> -> vector<512x128xf32>
    %c0_3 = arith.constant 0 : index
    %c0_4 = arith.constant 0 : index
    %3 = vector.load %arg3[%c0_3, %c0_4] : memref<1x128xf32, #tpu.memory_space<vmem>>, vector<1x128xf32>
    %4 = vector.broadcast %3 : vector<1x128xf32> to vector<512x128xf32>
    %5 = arith.addf %2, %4 : vector<512x128xf32>
    %cst_5 = arith.constant 0.000000e+00 : f32
    %6 = vector.broadcast %cst_5 : f32 to vector<512x128xf32>
    %7 = arith.maximumf %5, %6 : vector<512x128xf32>
    %8 = arith.truncf %7 : vector<512x128xf32> to vector<512x128xbf16>
    %c0_6 = arith.constant 0 : index
    %c0_7 = arith.constant 0 : index
    %9 = vector.load %arg4[%c0_6, %c0_7] : memref<128x128xbf16, #tpu.memory_space<vmem>>, vector<128x128xbf16>
    %cst_8 = arith.constant dense<0.000000e+00> : vector<512x128xf32>
    %10 = tpu.matmul %8, %9, %cst_8 {dimension_numbers = #tpu.dot_dimension_numbers<[1], [0], [0], [1], [0, 0, 1, 1], [], []>} : vector<512x128xbf16>, vector<128x128xbf16>, vector<512x128xf32> -> vector<512x128xf32>
    %c0_9 = arith.constant 0 : index
    %c0_10 = arith.constant 0 : index
    %11 = vector.load %arg5[%c0_9, %c0_10] : memref<1x128xf32, #tpu.memory_space<vmem>>, vector<1x128xf32>
    %12 = vector.broadcast %11 : vector<1x128xf32> to vector<512x128xf32>
    %13 = arith.addf %10, %12 : vector<512x128xf32>
    %cst_11 = arith.constant 0.000000e+00 : f32
    %14 = vector.broadcast %cst_11 : f32 to vector<512x128xf32>
    %15 = arith.maximumf %13, %14 : vector<512x128xf32>
    %16 = arith.truncf %15 : vector<512x128xf32> to vector<512x128xbf16>
    %c0_12 = arith.constant 0 : index
    %c0_13 = arith.constant 0 : index
    %17 = vector.load %arg6[%c0_12, %c0_13] : memref<128x4xbf16, #tpu.memory_space<vmem>>, vector<128x4xbf16>
    %cst_14 = arith.constant dense<0.000000e+00> : vector<512x4xf32>
    %18 = tpu.matmul %16, %17, %cst_14 {dimension_numbers = #tpu.dot_dimension_numbers<[1], [0], [0], [1], [0, 0, 1, 1], [], []>} : vector<512x128xbf16>, vector<128x4xbf16>, vector<512x4xf32> -> vector<512x4xf32>
    %c0_15 = arith.constant 0 : index
    %c0_16 = arith.constant 0 : index
    %19 = vector.load %arg7[%c0_15, %c0_16] : memref<1x4xf32, #tpu.memory_space<vmem>>, vector<1x4xf32>
    %20 = vector.broadcast %19 : vector<1x4xf32> to vector<512x4xf32>
    %21 = arith.addf %18, %20 : vector<512x4xf32>
    %c0_17 = arith.constant 0 : index
    %c0_18 = arith.constant 0 : index
    %22 = vector.load %arg8[%c0_17, %c0_18] : memref<512x4xf32, #tpu.memory_space<vmem>>, vector<512x4xf32>
    tpu.vector_store %arg8[%c0_17, %c0_18], %21 {strides = array<i32>} : memref<512x4xf32, #tpu.memory_space<vmem>>, vector<512x4xf32>,
    return
  }
  func.func @transform_0(%arg0: i32) -> (i32, i32) {
    %c0_i32 = arith.constant 0 : i32
    %c0_i32_0 = arith.constant 0 : i32
    return %arg0, %c0_i32 : i32, i32
  }
  func.func @transform_1(%arg0: i32) -> (i32, i32) {
    %c0_i32 = arith.constant 0 : i32
    %c0_i32_0 = arith.constant 0 : i32
    %c0_i32_1 = arith.constant 0 : i32
    return %c0_i32, %c0_i32_0 : i32, i32
  }
  func.func @transform_2(%arg0: i32) -> (i32, i32) {
    %c0_i32 = arith.constant 0 : i32
    %c0_i32_0 = arith.constant 0 : i32
    %c0_i32_1 = arith.constant 0 : i32
    return %c0_i32, %c0_i32_0 : i32, i32
  }
  func.func @transform_3(%arg0: i32) -> (i32, i32) {
    %c0_i32 = arith.constant 0 : i32
    %c0_i32_0 = arith.constant 0 : i32
    %c0_i32_1 = arith.constant 0 : i32
    return %c0_i32, %c0_i32_0 : i32, i32
  }
  func.func @transform_4(%arg0: i32) -> (i32, i32) {
    %c0_i32 = arith.constant 0 : i32
    %c0_i32_0 = arith.constant 0 : i32
    %c0_i32_1 = arith.constant 0 : i32
    return %c0_i32, %c0_i32_0 : i32, i32
  }
  func.func @transform_5(%arg0: i32) -> (i32, i32) {
    %c0_i32 = arith.constant 0 : i32
    %c0_i32_0 = arith.constant 0 : i32
    %c0_i32_1 = arith.constant 0 : i32
    return %c0_i32, %c0_i32_0 : i32, i32
  }
  func.func @transform_6(%arg0: i32) -> (i32, i32) {
    %c0_i32 = arith.constant 0 : i32
    %c0_i32_0 = arith.constant 0 : i32
    %c0_i32_1 = arith.constant 0 : i32
    return %c0_i32, %c0_i32_0 : i32, i32
  }
  func.func @transform_7(%arg0: i32) -> (i32, i32) {
    %c0_i32 = arith.constant 0 : i32
    %c0_i32_0 = arith.constant 0 : i32
    return %arg0, %c0_i32 : i32, i32
  }
}

</mosaic_0001>

<bundles_post_ra>
// kernel: tpu_custom_call.1
= control target key start
LH: loop header
LB: loop body
LE: loop exit
PB: predicated region body
PF: predicated region fallthrough
CT: control target
= control target key end

     0   :  { %s2517_s24 = smov 0   ;;  %s3028_s0 = inlined_call_operand.vmem [shape: bf16[1024,39], index: 0, kind: input, shape index: {}]   ;;  %s3029_s1 = inlined_call_operand.vmem [shape: bf16[39,128], index: 1, kind: input, shape index: {}]   ;;  %s3030_s2 = inlined_call_operand.vmem [shape: f32[1,128], index: 2, kind: input, shape index: {}]   ;;  %s3031_s3 = inlined_call_operand.vmem [shape: bf16[128,128], index: 3, kind: input, shape index: {}]   ;;  %s3032_s4 = inlined_call_operand.vmem [shape: f32[1,128], index: 4, kind: input, shape index: {}]   ;;  %s3033_s5 = inlined_call_operand.vmem [shape: bf16[128,4], index: 5, kind: input, shape index: {}]   ;;  %s3034_s6 = inlined_call_operand.vmem [shape: f32[1,4], index: 6, kind: input, shape index: {}]   ;;  %s3035_s7 = inlined_call_operand.vmem [shape: f32[1024,4], index: 7, kind: output, shape index: {}]  }
   0x1 LB: > { %s1960_s25 = sadd.s32 4294967295, %s2474_s24   ;;  %p1964_p0 = scmp.ge.s32.totalorder %s2474_s24, 1  ;;  %s2474_s24 = sphi %s2517_s24, %s17_s24  }
   0x2   : > { %p238_p1 = scmp.lt.s32.totalorder %s2474_s24, 3 }
   0x4   : > { %p239_p2 = pnand %p1964_p0, %p238_p1 }
   0x5   : > { %v2417_v0 = vld [vmem:[%s3029_s1] sm:$0xff] (!%p239_p2)   ;;  %vm631_vm0 = vcmask (!%p239_p2), 1042432   ;;  %v2418_v1 = vld [vmem:[%s3029_s1 + $0x8] sm:$0xff] (!%p239_p2)   ;;  %vm632_vm1 = vcmask (!%p239_p2), 1043456   ;;  %v2419_v2 = vld [vmem:[%s3029_s1 + $0x10] ss:$0 sps:$4 sm:$0xff] (!%p239_p2)  }
   0x6   : > { %242 = sbr.rel (%p239_p2) target bundleno = 800 (0x320), region = 48  ;;  %2172 = vmatprep.subr.bf16.mxu0 (!%p239_p2), %v2417_v0  ;;  %s1965_s9 = sshll.u32 (!%p239_p2), %s1960_s25, 6  ;;  %2402 = vmatprep.subr.bf16.mxu1 (!%p239_p2), %v2417_v0  ;;  %v2476_v3 = vmov (!%p239_p2), 65535   ;;  %vm534_vm2 = vcmask (!%p239_p2), 318464   ;;  %v2452_v7 = vld [vmem:[%s3031_s3] sm:$0xff] (!%p239_p2)   ;;  %v2453_v14 = vld [vmem:[%s3031_s3 + $0x8] sm:$0xff] (!%p239_p2)  }
   0x7   : > { %2173 = vmatpush3.bf16.msra.mxu0 (!%p239_p2), %v2417_v0  ;;  %v633_v4 = vsel (!%p239_p2), %vm631_vm0, 4294967295, %v2476_v3  ;;  %p271_p3 = scmp.lt.s32.totalorder (!%p239_p2), %s1965_s9, 127  ;;  %2405 = vmatpush3.bf16.msra.mxu1 (!%p239_p2), %v2417_v0  ;;  %v2454_v19 = vld [vmem:[%s3031_s3 + $0x10] sm:$0xff] (!%p239_p2)   ;;  %v2455_v21 = vld [vmem:[%s3031_s3 + $0x18] sm:$0xff] (!%p239_p2)   ;;  %v2456_v25 = vld [vmem:[%s3031_s3 + $0x20] sm:$0xff] (!%p239_p2)   ;;  %vm1839_vm3 = vcmask (!%p239_p2), 31744  }
   0x8   : > { %2174 = vmatprep.subr.bf16.mxu0 (!%p239_p2), %v2418_v1  ;;  %v634_v5 = vsel (!%p239_p2), %vm632_vm1, %v633_v4, 0  ;;  %2403 = vmatprep.subr.bf16.mxu1 (!%p239_p2), %v2418_v1  ;;  %v2457_v30 = vld [vmem:[%s3031_s3 + $0x28] sm:$0xff] (!%p239_p2)   ;;  %v2458_v31 = vld [vmem:[%s3031_s3 + $0x30] sm:$0xff] (!%p239_p2)   ;;  %v2459_v46 = vld [vmem:[%s3031_s3 + $0x38] sm:$0xff] (!%p239_p2)  }
   0x9   : > { %v636_v6 = vand.u32 (!%p239_p2), %v2419_v2, %v634_v5  ;;  %v2633_v47 = vld [vmem:[%s3030_s2] ss:$0 sm:$0xff] (!%p239_p2)  ;;  %v2461_v56 = vld [vmem:[%s3033_s5 + $0x8] sm:$0xff] (!%p239_p2)   ;;  %v2462_v63 = vld [vmem:[%s3033_s5 + $0x10] sm:$0xff] (!%p239_p2)  }
   0xa   : > { %v2460_v55 = vld [vmem:[%s3033_s5] sm:$0xff] (!%p239_p2)  }
   0xb   : > { %2175 = vmatpush3.bf16.msra.mxu0 (!%p239_p2), %v2418_v1  ;;  %2406 = vmatpush3.bf16.msra.mxu1 (!%p239_p2), %v2418_v1 }
   0xc   : > { %2176 = vmatprep.subr.bf16.mxu0 (!%p239_p2), %v636_v6  ;;  %2404 = vmatprep.subr.bf16.mxu1 (!%p239_p2), %v636_v6 }
   0xd   : > { %s3037_s9 = smov (!%p271_p3, %s1965_s9), 127 }
   0xe   : > { %s1966_s10 = sshll.u32 %s3037_s9, 2  ;;  %s1968_s30 = sshll.u32 %s3037_s9, 3 }
   0xf   : > { %s2540_s13 = scalar_lea.vmem %s3028_s0, %s1966_s10  ;;  %2177 = vmatpush3.bf16.msra.mxu0 %v636_v6  ;;  %2407 = vmatpush3.bf16.msra.mxu1 %v636_v6 }
  0x10   : > { %v2420_v8 = vld [vmem:[%s2540_s13] sm:$0xff]   ;;  %v2421_v9 = vld [vmem:[%s2540_s13 + $0x8] sm:$0xff]   ;;  %v2422_v10 = vld [vmem:[%s2540_s13 + $0x10] sm:$0xff]   ;;  %2242 = vmatprep.subr.bf16.mxu1 %v2452_v7  ;;  %2322 = vmatprep.subr.bf16.mxu0 %v2460_v55 }
  0x11   : > { %2178 = vmatprep.mubr.msk.bf16.mxu0 %vm534_vm2, %v2420_v8  ;;  %v2423_v11 = vld [vmem:[%s2540_s13 + $0x18] sm:$0xff]   ;;  %v2424_v12 = vld [vmem:[%s2540_s13 + $0x20] sm:$0xff]   ;;  %v2425_v13 = vld [vmem:[%s2540_s13 + $0x28] sm:$0xff]  }
  0x12   : > { %2179 = vmatmul.mubr.msk.bf16.vlgmr.msra.gmra.mrb[0].mxu0 %vm534_vm2, %v2421_v9  ;;  %v2426_v15 = vld [vmem:[%s2540_s13 + $0x30] sm:$0xff]   ;;  %v2436_v16 = vld [vmem:[%s2540_s13 + $0x80] sm:$0xff]   ;;  %v2437_v17 = vld [vmem:[%s2540_s13 + $0x88] sm:$0xff]  }
  0x13   : > { %2182 = vmatprep.mubr.msk.bf16.mxu0 %vm534_vm2, %v2422_v10  ;;  %2210 = vmatprep.mubr.msk.bf16.mxu1 %vm534_vm2, %v2436_v16  ;;  %v2438_v18 = vld [vmem:[%s2540_s13 + $0x90] sm:$0xff]   ;;  %v2439_v20 = vld [vmem:[%s2540_s13 + $0x98] sm:$0xff]   ;;  %v2440_v22 = vld [vmem:[%s2540_s13 + $0xa0] sm:$0xff]  }
  0x14   : > { %2211 = vmatmul.mubr.msk.bf16.vlgmr.msra.gmra.mrb[0].mxu1 %vm534_vm2, %v2437_v17  ;;  %v2427_v23 = vld [vmem:[%s2540_s13 + $0x38] sm:$0xff]   ;;  %v2428_v24 = vld [vmem:[%s2540_s13 + $0x40] sm:$0xff]   ;;  %v2429_v26 = vld [vmem:[%s2540_s13 + $0x48] sm:$0xff]   ;;  %2323 = vmatpush3.bf16.msra.mxu0 %v2460_v55 }
  0x15   : > { %2214 = vmatprep.mubr.msk.bf16.mxu1 %vm534_vm2, %v2438_v18  ;;  %2243 = vmatpush3.bf16.msra.mxu1 %v2452_v7  ;;  %v2441_v27 = vld [vmem:[%s2540_s13 + $0xa8] sm:$0xff]   ;;  %v2430_v28 = vld [vmem:[%s2540_s13 + $0x50] sm:$0xff]   ;;  %v2443_v32 = vld [vmem:[%s2540_s13 + $0xb8] sm:$0xff]  }
  0x16   : > { %2244 = vmatprep.subr.bf16.mxu1 %v2453_v14  ;;  %v2442_v29 = vld [vmem:[%s2540_s13 + $0xb0] sm:$0xff]   ;;  %v2444_v33 = vld [vmem:[%s2540_s13 + $0xc0] sm:$0xff]   ;;  %v2431_v34 = vld [vmem:[%s2540_s13 + $0x58] sm:$0xff]   ;;  %2324 = vmatprep.subr.bf16.mxu0 %v2461_v56 }
  0x17   : > { %v2432_v35 = vld [vmem:[%s2540_s13 + $0x60] sm:$0xff]   ;;  %v2445_v36 = vld [vmem:[%s2540_s13 + $0xc8] sm:$0xff]   ;;  %v2446_v37 = vld [vmem:[%s2540_s13 + $0xd0] sm:$0xff]  }
  0x18   : > { %v2433_v38 = vld [vmem:[%s2540_s13 + $0x68] sm:$0xff]   ;;  %v2434_v39 = vld [vmem:[%s2540_s13 + $0x70] sm:$0xff]   ;;  %v2447_v40 = vld [vmem:[%s2540_s13 + $0xd8] sm:$0xff]   ;;  %2325 = vmatpush3.bf16.msra.mxu0 %v2461_v56 }
  0x19   : > { %2245 = vmatpush3.bf16.msra.mxu1 %v2453_v14  ;;  %v2448_v41 = vld [vmem:[%s2540_s13 + $0xe0] sm:$0xff]   ;;  %v2435_v42 = vld [vmem:[%s2540_s13 + $0x78] sm:$0xff]   ;;  %v2449_v43 = vld [vmem:[%s2540_s13 + $0xe8] sm:$0xff]   ;;  %2326 = vmatprep.subr.bf16.mxu0 %v2462_v63 }
  0x1a   : > { %2183 = vmatmul.mubr.msk.bf16.gmra.mrb[4].mxu0 %vm534_vm2, %v2423_v11  ;;  %2246 = vmatprep.subr.bf16.mxu1 %v2454_v19  ;;  %v2450_v44 = vld [vmem:[%s2540_s13 + $0xf0] sm:$0xff]   ;;  %v2451_v45 = vld [vmem:[%s2540_s13 + $0xf8] sm:$0xff]   ;;  %v2464_v18 = vld [vmem:[%s3033_s5 + $0x20] sm:$0xff]   ;;  %s2831_s13 = scalar_lea.vmem %s3035_s7, %s1968_s30 }
  0x1b   : > { %2186 = vmatprep.mubr.msk.bf16.mxu0 %vm534_vm2, %v2424_v12  ;;  %v2463_v8 = vld [vmem:[%s3033_s5 + $0x18] sm:$0xff]  }
  0x1c   : > { %2215 = vmatmul.mubr.msk.bf16.gmra.mrb[4].mxu1 %vm534_vm2, %v2439_v20  ;;  %2327 = vmatpush3.bf16.msra.mxu0 %v2462_v63 }
  0x1d   : > { %2218 = vmatprep.mubr.msk.bf16.mxu1 %vm534_vm2, %v2440_v22  ;;  %2247 = vmatpush3.bf16.msra.mxu1 %v2454_v19 }
  0x1e   : > { %2248 = vmatprep.subr.bf16.mxu1 %v2455_v21  ;;  %2328 = vmatprep.subr.bf16.mxu0 %v2463_v8 }
  0x20   : > { %2329 = vmatpush3.bf16.msra.mxu0 %v2463_v8 }
  0x21   : > { %2249 = vmatpush3.bf16.msra.mxu1 %v2455_v21  ;;  %2330 = vmatprep.subr.bf16.mxu0 %v2464_v18 }
  0x22   : > { %2187 = vmatmul.mubr.msk.bf16.gmra.mrb[8].mxu0 %vm534_vm2, %v2425_v13  ;;  %2250 = vmatprep.subr.bf16.mxu1 %v2456_v25 }
  0x23   : > { %2190 = vmatprep.mubr.msk.bf16.mxu0 %vm534_vm2, %v2426_v15 }
  0x24   : > { %2219 = vmatmul.mubr.msk.bf16.gmra.mrb[8].mxu1 %vm534_vm2, %v2441_v27  ;;  %2331 = vmatpush3.bf16.msra.mxu0 %v2464_v18 }
  0x25   : > { %2222 = vmatprep.mubr.msk.bf16.mxu1 %vm534_vm2, %v2442_v29  ;;  %2251 = vmatpush3.bf16.msra.mxu1 %v2456_v25 }
  0x26   : > { %2252 = vmatprep.subr.bf16.mxu1 %v2457_v30 }
  0x29   : > { %2253 = vmatpush3.bf16.msra.mxu1 %v2457_v30 }
  0x2a   : > { %2191 = vmatmul.mubr.msk.bf16.gmra.mrb[12].mxu0 %vm534_vm2, %v2427_v23  ;;  %2254 = vmatprep.subr.bf16.mxu1 %v2458_v31 }
  0x2b   : > { %2194 = vmatprep.mubr.msk.bf16.mxu0 %vm534_vm2, %v2428_v24 }
  0x2c   : > { %2223 = vmatmul.mubr.msk.bf16.gmra.mrb[12].mxu1 %vm534_vm2, %v2443_v32 }
  0x2d   : > { %2226 = vmatprep.mubr.msk.bf16.mxu1 %vm534_vm2, %v2444_v33  ;;  %2255 = vmatpush3.bf16.msra.mxu1 %v2458_v31 }
  0x2e   : > { %2256 = vmatprep.subr.bf16.mxu1 %v2459_v46 }
  0x31   : > { %2257 = vmatpush3.bf16.msra.mxu1 %v2459_v46 }
  0x32   : > { %2195 = vmatmul.mubr.msk.bf16.gmra.mrb[16].mxu0 %vm534_vm2, %v2429_v26 }
  0x33   : > { %2198 = vmatprep.mubr.msk.bf16.mxu0 %vm534_vm2, %v2430_v28 }
  0x34   : > { %2227 = vmatmul.mubr.msk.bf16.gmra.mrb[16].mxu1 %vm534_vm2, %v2445_v36 }
  0x35   : > { %2230 = vmatprep.mubr.msk.bf16.mxu1 %vm534_vm2, %v2446_v37 }
  0x3a   : > { %2199 = vmatmul.mubr.msk.bf16.gmra.mrb[20].mxu0 %vm534_vm2, %v2431_v34 }
  0x3b   : > { %2202 = vmatprep.mubr.msk.bf16.mxu0 %vm534_vm2, %v2432_v35  ;;  %v2465_v35 = vld [vmem:[%s3033_s5 + $0x28] sm:$0xff]  }
  0x3c   : > { %2231 = vmatmul.mubr.msk.bf16.gmra.mrb[20].mxu1 %vm534_vm2, %v2447_v40  ;;  %2332 = vmatprep.subr.bf16.mxu0 %v2465_v35 }
  0x3d   : > { %2234 = vmatprep.mubr.msk.bf16.mxu1 %vm534_vm2, %v2448_v41  ;;  %2333 = vmatpush3.bf16.msra.mxu0 %v2465_v35 }
  0x42   : > { %2203 = vmatmul.mubr.msk.bf16.gmra.mrb[24].mxu0 %vm534_vm2, %v2433_v38 }
  0x43   : > { %2206 = vmatprep.mubr.msk.bf16.mxu0 %vm534_vm2, %v2434_v39 }
  0x44   : > { %2235 = vmatmul.mubr.msk.bf16.gmra.mrb[24].mxu1 %vm534_vm2, %v2449_v43 }
  0x45   : > { %2238 = vmatprep.mubr.msk.bf16.mxu1 %vm534_vm2, %v2450_v44 }
  0x4a   : > { %2207 = vmatmul.mubr.msk.bf16.gmra.mrb[28].mxu0 %vm534_vm2, %v2435_v42 }
  0x4c   : > { %2239 = vmatmul.mubr.msk.bf16.gmra.mrb[28].mxu1 %vm534_vm2, %v2451_v45 }
  0xe5   : > { %v2180_v48 = vpop.f32.mrb[0].mxu0 }
  0xe6   : > { %v681_v49 = vadd.f32 %v2180_v48, %v2633_v47  ;;  %v672_v50 = vpop.f32.mrb[1].mxu0 }
  0xe7   : > { %v673_v51 = vadd.f32 %v2633_v47, %v672_v50  ;;  %v2181_v52 = vpop.f32.mrb[2].mxu0  ;;  %v2212_v14 = vpop.f32.mrb[0].mxu1 }
  0xe8   : > { %v684_v53 = vadd.f32 %v2181_v52, %v2633_v47  ;;  %v675_v54 = vpop.f32.mrb[3].mxu0  ;;  %v929_v58 = vmax.f32 %v681_v49, 0.0  ;;  %v809_v16 = vadd.f32 %v2212_v14, %v2633_v47  ;;  %v800_v17 = vpop.f32.mrb[1].mxu1  ;;  %v2466_v49 = vld [vmem:[%s3033_s5 + $0x30] sm:$0xff]  }
  0xe9   : > { %v676_v57 = vadd.f32 %v2633_v47, %v675_v54  ;;  %v927_v60 = vmax.f32 %v673_v51, 0.0  ;;  %v801_v21 = vadd.f32 %v2633_v47, %v800_v17  ;;  %v2213_v22 = vpop.f32.mrb[2].mxu1  ;;  %2334 = vmatprep.subr.bf16.mxu0 %v2466_v49 }
  0xea   : > { %v930_v59 = vmax.f32 %v684_v53, 0.0  ;;  %v961_v25 = vmax.f32 %v809_v16, 0.0  ;;  %v812_v26 = vadd.f32 %v2213_v22, %v2633_v47  ;;  %v803_v27 = vpop.f32.mrb[3].mxu1  ;;  %2335 = vmatpush3.bf16.msra.mxu0 %v2466_v49 }
  0xeb   : > { %v928_v61 = vmax.f32 %v676_v57, 0.0  ;;  %v959_v30 = vmax.f32 %v801_v21, 0.0  ;;  %v804_v31 = vadd.f32 %v2633_v47, %v803_v27 }
  0xec   : > { %v992_v62 = vpack.c.bf16 %v930_v59, %v929_v58  ;;  %v962_v34 = vmax.f32 %v812_v26, 0.0 }
  0xed   : > { %v991_v0 = vpack.c.bf16 %v928_v61, %v927_v60  ;;  %v2184_v1 = vpop.f32.mrb[4].mxu0  ;;  %v960_v37 = vmax.f32 %v804_v31, 0.0 }
  0xee   : > { %v697_v2 = vadd.f32 %v2184_v1, %v2633_v47  ;;  %v688_v3 = vpop.f32.mrb[5].mxu0  ;;  %v2669_v40 = vpack.c.bf16 %v962_v34, %v961_v25 }
  0xef   : > { %v689_v4 = vadd.f32 %v2633_v47, %v688_v3  ;;  %v2185_v5 = vpop.f32.mrb[6].mxu0  ;;  %2258 = vmatprep.mubr.bf16.mxu1 %v991_v0  ;;  %v2671_v43 = vpack.c.bf16 %v960_v37, %v959_v30  ;;  %v2216_v44 = vpop.f32.mrb[4].mxu1 }
  0xf0   : > { %v700_v6 = vadd.f32 %v2185_v5, %v2633_v47  ;;  %v691_v7 = vpop.f32.mrb[7].mxu0  ;;  %2259 = vmatmul.mubr.bf16.vlgmr.msra.gmra.mrb[32].mxu1 %v992_v62  ;;  %v933_v10 = vmax.f32 %v697_v2, 0.0  ;;  %v825_v46 = vadd.f32 %v2216_v44, %v2633_v47  ;;  %v816_v48 = vpop.f32.mrb[5].mxu1 }
  0xf1   : > { %v692_v9 = vadd.f32 %v2633_v47, %v691_v7  ;;  %v931_v12 = vmax.f32 %v689_v4, 0.0  ;;  %v817_v52 = vadd.f32 %v2633_v47, %v816_v48  ;;  %v2217_v53 = vpop.f32.mrb[6].mxu1 }
  0xf2   : > { %v934_v11 = vmax.f32 %v700_v6, 0.0  ;;  %v965_v56 = vmax.f32 %v825_v46, 0.0  ;;  %v828_v57 = vadd.f32 %v2217_v53, %v2633_v47  ;;  %v819_v58 = vpop.f32.mrb[7].mxu1 }
  0xf3   : > { %v932_v13 = vmax.f32 %v692_v9, 0.0  ;;  %v963_v61 = vmax.f32 %v817_v52, 0.0  ;;  %v820_v62 = vadd.f32 %v2633_v47, %v819_v58 }
  0xf4   : > { %v994_v15 = vpack.c.bf16 %v934_v11, %v933_v10  ;;  %v966_v1 = vmax.f32 %v828_v57, 0.0 }
  0xf5   : > { %v993_v19 = vpack.c.bf16 %v932_v13, %v931_v12  ;;  %v2188_v20 = vpop.f32.mrb[8].mxu0  ;;  %v964_v3 = vmax.f32 %v820_v62, 0.0 }
  0xf6   : > { %v713_v23 = vadd.f32 %v2188_v20, %v2633_v47  ;;  %v704_v24 = vpop.f32.mrb[9].mxu0  ;;  %v2684_v6 = vpack.c.bf16 %v966_v1, %v965_v56 }
  0xf7   : > { %v705_v28 = vadd.f32 %v2633_v47, %v704_v24  ;;  %v2189_v29 = vpop.f32.mrb[10].mxu0  ;;  %2262 = vmatprep.mubr.bf16.mxu1 %v993_v19  ;;  %v2686_v9 = vpack.c.bf16 %v964_v3, %v963_v61  ;;  %v2220_v10 = vpop.f32.mrb[8].mxu1 }
  0xf8   : > { %v716_v32 = vadd.f32 %v2189_v29, %v2633_v47  ;;  %v707_v33 = vpop.f32.mrb[11].mxu0  ;;  %2263 = vmatmul.mubr.bf16.gmra.mrb[36].mxu1 %v994_v15  ;;  %v937_v38 = vmax.f32 %v713_v23, 0.0  ;;  %v841_v12 = vadd.f32 %v2220_v10, %v2633_v47  ;;  %v832_v13 = vpop.f32.mrb[9].mxu1 }
  0xf9   : > { %v708_v36 = vadd.f32 %v2633_v47, %v707_v33  ;;  %v935_v41 = vmax.f32 %v705_v28, 0.0  ;;  %v833_v16 = vadd.f32 %v2633_v47, %v832_v13  ;;  %v2221_v17 = vpop.f32.mrb[10].mxu1 }
  0xfa   : > { %v938_v39 = vmax.f32 %v716_v32, 0.0  ;;  %v969_v20 = vmax.f32 %v841_v12, 0.0  ;;  %v844_v21 = vadd.f32 %v2221_v17, %v2633_v47  ;;  %v835_v22 = vpop.f32.mrb[11].mxu1 }
  0xfb   : > { %v936_v42 = vmax.f32 %v708_v36, 0.0  ;;  %v967_v25 = vmax.f32 %v833_v16, 0.0  ;;  %v836_v26 = vadd.f32 %v2633_v47, %v835_v22 }
  0xfc   : > { %v996_v45 = vpack.c.bf16 %v938_v39, %v937_v38  ;;  %v970_v29 = vmax.f32 %v844_v21, 0.0 }
  0xfd   : > { %v995_v50 = vpack.c.bf16 %v936_v42, %v935_v41  ;;  %v2192_v51 = vpop.f32.mrb[12].mxu0  ;;  %v968_v31 = vmax.f32 %v836_v26, 0.0 }
  0xfe   : > { %v729_v54 = vadd.f32 %v2192_v51, %v2633_v47  ;;  %v720_v55 = vpop.f32.mrb[13].mxu0  ;;  %v2696_v34 = vpack.c.bf16 %v970_v29, %v969_v20 }
  0xff   : > { %v721_v59 = vadd.f32 %v2633_v47, %v720_v55  ;;  %v2193_v60 = vpop.f32.mrb[14].mxu0  ;;  %2266 = vmatprep.mubr.bf16.mxu1 %v995_v50  ;;  %v2698_v37 = vpack.c.bf16 %v968_v31, %v967_v25  ;;  %v2224_v38 = vpop.f32.mrb[12].mxu1 }
 0x100   : > { %v732_v63 = vadd.f32 %v2193_v60, %v2633_v47  ;;  %v723_v0 = vpop.f32.mrb[15].mxu0  ;;  %2267 = vmatmul.mubr.bf16.gmra.mrb[40].mxu1 %v996_v45  ;;  %v941_v4 = vmax.f32 %v729_v54, 0.0  ;;  %v857_v41 = vadd.f32 %v2224_v38, %v2633_v47  ;;  %v848_v42 = vpop.f32.mrb[13].mxu1 }
 0x101   : > { %v724_v2 = vadd.f32 %v2633_v47, %v723_v0  ;;  %v939_v7 = vmax.f32 %v721_v59, 0.0  ;;  %v849_v46 = vadd.f32 %v2633_v47, %v848_v42  ;;  %v2225_v48 = vpop.f32.mrb[14].mxu1 }
 0x102   : > { %v942_v5 = vmax.f32 %v732_v63, 0.0  ;;  %v973_v51 = vmax.f32 %v857_v41, 0.0  ;;  %v860_v52 = vadd.f32 %v2225_v48, %v2633_v47  ;;  %v851_v53 = vpop.f32.mrb[15].mxu1 }
 0x103   : > { %v940_v8 = vmax.f32 %v724_v2, 0.0  ;;  %v971_v56 = vmax.f32 %v849_v46, 0.0  ;;  %v852_v57 = vadd.f32 %v2633_v47, %v851_v53 }
 0x104   : > { %v998_v11 = vpack.c.bf16 %v942_v5, %v941_v4  ;;  %v974_v60 = vmax.f32 %v860_v52, 0.0 }
 0x105   : > { %v997_v14 = vpack.c.bf16 %v940_v8, %v939_v7  ;;  %v2196_v15 = vpop.f32.mrb[16].mxu0  ;;  %v972_v62 = vmax.f32 %v852_v57, 0.0 }
 0x106   : > { %v745_v18 = vadd.f32 %v2196_v15, %v2633_v47  ;;  %v736_v19 = vpop.f32.mrb[17].mxu0  ;;  %v2708_v1 = vpack.c.bf16 %v974_v60, %v973_v51 }
 0x107   : > { %v737_v23 = vadd.f32 %v2633_v47, %v736_v19  ;;  %v2197_v24 = vpop.f32.mrb[18].mxu0  ;;  %2270 = vmatprep.mubr.bf16.mxu1 %v997_v14  ;;  %v2710_v4 = vpack.c.bf16 %v972_v62, %v971_v56  ;;  %v2228_v5 = vpop.f32.mrb[16].mxu1 }
 0x108   : > { %v748_v27 = vadd.f32 %v2197_v24, %v2633_v47  ;;  %v739_v28 = vpop.f32.mrb[19].mxu0  ;;  %2271 = vmatmul.mubr.bf16.gmra.mrb[44].mxu1 %v998_v11  ;;  %v945_v32 = vmax.f32 %v745_v18, 0.0  ;;  %v873_v8 = vadd.f32 %v2228_v5, %v2633_v47  ;;  %v864_v10 = vpop.f32.mrb[17].mxu1 }
 0x109   : > { %v740_v30 = vadd.f32 %v2633_v47, %v739_v28  ;;  %v943_v35 = vmax.f32 %v737_v23, 0.0  ;;  %v865_v13 = vadd.f32 %v2633_v47, %v864_v10  ;;  %v2229_v14 = vpop.f32.mrb[18].mxu1 }
 0x10a   : > { %v946_v33 = vmax.f32 %v748_v27, 0.0  ;;  %v977_v17 = vmax.f32 %v873_v8, 0.0  ;;  %v876_v18 = vadd.f32 %v2229_v14, %v2633_v47  ;;  %v867_v19 = vpop.f32.mrb[19].mxu1 }
 0x10b   : > { %v944_v36 = vmax.f32 %v740_v30, 0.0  ;;  %v975_v22 = vmax.f32 %v865_v13, 0.0  ;;  %v868_v23 = vadd.f32 %v2633_v47, %v867_v19 }
 0x10c   : > { %v1000_v39 = vpack.c.bf16 %v946_v33, %v945_v32  ;;  %v978_v26 = vmax.f32 %v876_v18, 0.0 }
 0x10d   : > { %v999_v44 = vpack.c.bf16 %v944_v36, %v943_v35  ;;  %v2200_v45 = vpop.f32.mrb[20].mxu0  ;;  %v976_v28 = vmax.f32 %v868_v23, 0.0 }
 0x10e   : > { %v761_v49 = vadd.f32 %v2200_v45, %v2633_v47  ;;  %v752_v50 = vpop.f32.mrb[21].mxu0  ;;  %v2720_v31 = vpack.c.bf16 %v978_v26, %v977_v17 }
 0x10f   : > { %v753_v54 = vadd.f32 %v2633_v47, %v752_v50  ;;  %v2201_v55 = vpop.f32.mrb[22].mxu0  ;;  %2274 = vmatprep.mubr.bf16.mxu1 %v999_v44  ;;  %v2722_v35 = vpack.c.bf16 %v976_v28, %v975_v22  ;;  %v2232_v36 = vpop.f32.mrb[20].mxu1 }
 0x110   : > { %v764_v58 = vadd.f32 %v2201_v55, %v2633_v47  ;;  %v755_v59 = vpop.f32.mrb[23].mxu0  ;;  %2275 = vmatmul.mubr.bf16.gmra.mrb[48].mxu1 %v1000_v39  ;;  %v949_v63 = vmax.f32 %v761_v49, 0.0  ;;  %v889_v39 = vadd.f32 %v2232_v36, %v2633_v47  ;;  %v880_v41 = vpop.f32.mrb[21].mxu1 }
 0x111   : > { %v756_v61 = vadd.f32 %v2633_v47, %v755_v59  ;;  %v947_v2 = vmax.f32 %v753_v54, 0.0  ;;  %v881_v45 = vadd.f32 %v2633_v47, %v880_v41  ;;  %v2233_v46 = vpop.f32.mrb[22].mxu1 }
 0x112   : > { %v950_v0 = vmax.f32 %v764_v58, 0.0  ;;  %v981_v50 = vmax.f32 %v889_v39, 0.0  ;;  %v892_v51 = vadd.f32 %v2233_v46, %v2633_v47  ;;  %v883_v52 = vpop.f32.mrb[23].mxu1 }
 0x113   : > { %v948_v3 = vmax.f32 %v756_v61, 0.0  ;;  %v979_v55 = vmax.f32 %v881_v45, 0.0  ;;  %v884_v56 = vadd.f32 %v2633_v47, %v883_v52 }
 0x114   : > { %v1002_v7 = vpack.c.bf16 %v950_v0, %v949_v63  ;;  %v982_v59 = vmax.f32 %v892_v51, 0.0 }
 0x115   : > { %v1001_v11 = vpack.c.bf16 %v948_v3, %v947_v2  ;;  %v2204_v12 = vpop.f32.mrb[24].mxu0  ;;  %v980_v61 = vmax.f32 %v884_v56, 0.0 }
 0x116   : > { %v777_v15 = vadd.f32 %v2204_v12, %v2633_v47  ;;  %v768_v16 = vpop.f32.mrb[25].mxu0  ;;  %v1018_v0 = vpack.c.bf16 %v982_v59, %v981_v50 }
 0x117   : > { %v769_v20 = vadd.f32 %v2633_v47, %v768_v16  ;;  %v2205_v21 = vpop.f32.mrb[26].mxu0  ;;  %2278 = vmatprep.mubr.bf16.mxu1 %v1001_v11  ;;  %v1017_v5 = vpack.c.bf16 %v980_v61, %v979_v55 }
 0x118   : > { %v780_v24 = vadd.f32 %v2205_v21, %v2633_v47  ;;  %v771_v25 = vpop.f32.mrb[27].mxu0  ;;  %2279 = vmatmul.mubr.bf16.gmra.mrb[52].mxu1 %v1002_v7  ;;  %v953_v29 = vmax.f32 %v777_v15, 0.0  ;;  %v2236_v7 = vpop.f32.mrb[24].mxu1 }
 0x119   : > { %v772_v27 = vadd.f32 %v2633_v47, %v771_v25  ;;  %v951_v32 = vmax.f32 %v769_v20, 0.0  ;;  %v905_v10 = vadd.f32 %v2236_v7, %v2633_v47  ;;  %v896_v11 = vpop.f32.mrb[25].mxu1 }
 0x11a   : > { %v954_v30 = vmax.f32 %v780_v24, 0.0  ;;  %v897_v13 = vadd.f32 %v2633_v47, %v896_v11  ;;  %v2237_v14 = vpop.f32.mrb[26].mxu1 }
 0x11b   : > { %v952_v33 = vmax.f32 %v772_v27, 0.0  ;;  %v985_v15 = vmax.f32 %v905_v10, 0.0  ;;  %v908_v16 = vadd.f32 %v2237_v14, %v2633_v47  ;;  %v899_v17 = vpop.f32.mrb[27].mxu1 }
 0x11c   : > { %v1004_v38 = vpack.c.bf16 %v954_v30, %v953_v29  ;;  %v983_v18 = vmax.f32 %v897_v13, 0.0  ;;  %v900_v19 = vadd.f32 %v2633_v47, %v899_v17 }
 0x11d   : > { %v1003_v42 = vpack.c.bf16 %v952_v33, %v951_v32  ;;  %v2208_v44 = vpop.f32.mrb[28].mxu0  ;;  %v986_v20 = vmax.f32 %v908_v16, 0.0 }
 0x11e   : > { %v793_v48 = vadd.f32 %v2208_v44, %v2633_v47  ;;  %v784_v49 = vpop.f32.mrb[29].mxu0  ;;  %v984_v21 = vmax.f32 %v900_v19, 0.0 }
 0x11f   : > { %v785_v53 = vadd.f32 %v2633_v47, %v784_v49  ;;  %v2209_v54 = vpop.f32.mrb[30].mxu0  ;;  %2282 = vmatprep.mubr.bf16.mxu1 %v1003_v42  ;;  %v1020_v22 = vpack.c.bf16 %v986_v20, %v985_v15  ;;  %v2240_v24 = vpop.f32.mrb[28].mxu1 }
 0x120   : > { %v796_v57 = vadd.f32 %v2209_v54, %v2633_v47  ;;  %v787_v58 = vpop.f32.mrb[31].mxu0  ;;  %2283 = vmatmul.mubr.bf16.gmra.mrb[56].mxu1 %v1004_v38  ;;  %v957_v62 = vmax.f32 %v793_v48, 0.0  ;;  %v1019_v23 = vpack.c.bf16 %v984_v21, %v983_v18  ;;  %v921_v25 = vadd.f32 %v2240_v24, %v2633_v47  ;;  %v912_v26 = vpop.f32.mrb[29].mxu1 }
 0x121   : > { %v788_v60 = vadd.f32 %v2633_v47, %v787_v58  ;;  %v955_v2 = vmax.f32 %v785_v53, 0.0  ;;  %v913_v27 = vadd.f32 %v2633_v47, %v912_v26  ;;  %v2241_v28 = vpop.f32.mrb[30].mxu1 }
 0x122   : > { %v958_v63 = vmax.f32 %v796_v57, 0.0  ;;  %v989_v29 = vmax.f32 %v921_v25, 0.0  ;;  %v924_v30 = vadd.f32 %v2241_v28, %v2633_v47  ;;  %v915_v32 = vpop.f32.mrb[31].mxu1 }
 0x123   : > { %v956_v3 = vmax.f32 %v788_v60, 0.0  ;;  %v987_v33 = vmax.f32 %v913_v27, 0.0  ;;  %v916_v36 = vadd.f32 %v2633_v47, %v915_v32  ;;  %v2467_v47 = vld [vmem:[%s3033_s5 + $0x38] sm:$0xff]  }
 0x124   : > { %v1006_v8 = vpack.c.bf16 %v958_v63, %v957_v62  ;;  %2336 = vmatprep.subr.bf16.mxu0 %v2467_v47 }
 0x125   : > { %v1005_v12 = vpack.c.bf16 %v956_v3, %v955_v2  ;;  %v988_v38 = vmax.f32 %v916_v36, 0.0  ;;  %2337 = vmatpush3.bf16.msra.mxu0 %v2467_v47 }
 0x127   : > { %2286 = vmatprep.mubr.bf16.mxu1 %v1005_v12  ;;  %v1021_v41 = vpack.c.bf16 %v988_v38, %v987_v33 }
 0x128   : > { %2287 = vmatmul.mubr.bf16.gmra.mrb[60].mxu1 %v1006_v8 }
 0x129   : > { %2290 = vmatprep.mubr.bf16.mxu1 %v2671_v43  ;;  %v990_v43 = vmax.f32 %v924_v30, 0.0 }
 0x12b   : > { %v1022_v39 = vpack.c.bf16 %v990_v43, %v989_v29 }
 0x130   : > { %2291 = vmatmul.mubr.bf16.gmra.mrb[64].mxu1 %v2669_v40  ;;  %v2756_v40 = vld [vmem:[%s3032_s4] ss:$0 sm:$0xff] }
 0x131   : > { %2294 = vmatprep.mubr.bf16.mxu1 %v2686_v9 }
 0x138   : > { %2295 = vmatmul.mubr.bf16.gmra.mrb[68].mxu1 %v2684_v6 }
 0x139   : > { %2298 = vmatprep.mubr.bf16.mxu1 %v2698_v37 }
 0x140   : > { %2299 = vmatmul.mubr.bf16.gmra.mrb[72].mxu1 %v2696_v34 }
 0x141   : > { %2302 = vmatprep.mubr.bf16.mxu1 %v2710_v4 }
 0x148   : > { %2303 = vmatmul.mubr.bf16.gmra.mrb[76].mxu1 %v2708_v1 }
 0x149   : > { %2306 = vmatprep.mubr.bf16.mxu1 %v2722_v35 }
 0x150   : > { %2307 = vmatmul.mubr.bf16.gmra.mrb[80].mxu1 %v2720_v31 }
 0x151   : > { %2310 = vmatprep.mubr.bf16.mxu1 %v1017_v5 }
 0x158   : > { %2311 = vmatmul.mubr.bf16.gmra.mrb[84].mxu1 %v1018_v0 }
 0x159   : > { %2314 = vmatprep.mubr.bf16.mxu1 %v1019_v23 }
 0x160   : > { %2315 = vmatmul.mubr.bf16.gmra.mrb[88].mxu1 %v1020_v22 }
 0x161   : > { %2318 = vmatprep.mubr.bf16.mxu1 %v1021_v41 }
 0x168   : > { %2319 = vmatmul.mubr.bf16.gmra.mrb[92].mxu1 %v1022_v39 }
 0x1c3   : > { %v2260_v6 = vpop.f32.mrb[32].mxu1 }
 0x1c4   : > { %v1137_v9 = vadd.f32 %v2260_v6, %v2756_v40  ;;  %v1128_v34 = vpop.f32.mrb[33].mxu1 }
 0x1c5   : > { %v1129_v37 = vadd.f32 %v2756_v40, %v1128_v34  ;;  %v2261_v1 = vpop.f32.mrb[34].mxu1 }
 0x1c6   : > { %v1140_v4 = vadd.f32 %v2261_v1, %v2756_v40  ;;  %v1131_v31 = vpop.f32.mrb[35].mxu1  ;;  %v1385_v42 = vmax.f32 %v1137_v9, 0.0 }
 0x1c7   : > { %v1132_v35 = vadd.f32 %v2756_v40, %v1131_v31  ;;  %v1383_v45 = vmax.f32 %v1129_v37, 0.0 }
 0x1c8   : > { %v1386_v44 = vmax.f32 %v1140_v4, 0.0 }
 0x1c9   : > { %v1384_v46 = vmax.f32 %v1132_v35, 0.0 }
 0x1ca   : > { %v1448_v48 = vpack.c.bf16 %v1386_v44, %v1385_v42 }
 0x1cb   : > { %v1447_v49 = vpack.c.bf16 %v1384_v46, %v1383_v45  ;;  %v2264_v50 = vpop.f32.mrb[36].mxu1 }
 0x1cc   : > { %v1153_v51 = vadd.f32 %v2264_v50, %v2756_v40  ;;  %v1144_v52 = vpop.f32.mrb[37].mxu1 }
 0x1cd   : > { %v1145_v53 = vadd.f32 %v2756_v40, %v1144_v52  ;;  %v2265_v54 = vpop.f32.mrb[38].mxu1  ;;  %2338 = vmatprep.mubr.bf16.mxu0 %v1447_v49 }
 0x1ce   : > { %v1156_v55 = vadd.f32 %v2265_v54, %v2756_v40  ;;  %v1147_v56 = vpop.f32.mrb[39].mxu1  ;;  %2339 = vmatmul.mubr.bf16.vlgmr.msra.gmra.mrb[32].mxu0 %v1448_v48  ;;  %v1389_v58 = vmax.f32 %v1153_v51, 0.0 }
 0x1cf   : > { %v1148_v57 = vadd.f32 %v2756_v40, %v1147_v56  ;;  %v1387_v60 = vmax.f32 %v1145_v53, 0.0 }
 0x1d0   : > { %v1390_v59 = vmax.f32 %v1156_v55, 0.0 }
 0x1d1   : > { %v1388_v61 = vmax.f32 %v1148_v57, 0.0 }
 0x1d2   : > { %v1450_v62 = vpack.c.bf16 %v1390_v59, %v1389_v58 }
 0x1d3   : > { %v1449_v63 = vpack.c.bf16 %v1388_v61, %v1387_v60  ;;  %v2268_v0 = vpop.f32.mrb[40].mxu1 }
 0x1d4   : > { %v1169_v2 = vadd.f32 %v2268_v0, %v2756_v40  ;;  %v1160_v3 = vpop.f32.mrb[41].mxu1 }
 0x1d5   : > { %v1161_v5 = vadd.f32 %v2756_v40, %v1160_v3  ;;  %v2269_v7 = vpop.f32.mrb[42].mxu1  ;;  %2342 = vmatprep.mubr.bf16.mxu0 %v1449_v63 }
 0x1d6   : > { %v1172_v8 = vadd.f32 %v2269_v7, %v2756_v40  ;;  %v1163_v10 = vpop.f32.mrb[43].mxu1  ;;  %2343 = vmatmul.mubr.bf16.gmra.mrb[36].mxu0 %v1450_v62  ;;  %v1393_v12 = vmax.f32 %v1169_v2, 0.0 }
 0x1d7   : > { %v1164_v11 = vadd.f32 %v2756_v40, %v1163_v10  ;;  %v1391_v14 = vmax.f32 %v1161_v5, 0.0 }
 0x1d8   : > { %v1394_v13 = vmax.f32 %v1172_v8, 0.0 }
 0x1d9   : > { %v1392_v15 = vmax.f32 %v1164_v11, 0.0 }
 0x1da   : > { %v1452_v16 = vpack.c.bf16 %v1394_v13, %v1393_v12 }
 0x1db   : > { %v1451_v17 = vpack.c.bf16 %v1392_v15, %v1391_v14  ;;  %v2272_v18 = vpop.f32.mrb[44].mxu1 }
 0x1dc   : > { %v1185_v19 = vadd.f32 %v2272_v18, %v2756_v40  ;;  %v1176_v20 = vpop.f32.mrb[45].mxu1 }
 0x1dd   : > { %v1177_v21 = vadd.f32 %v2756_v40, %v1176_v20  ;;  %v2273_v22 = vpop.f32.mrb[46].mxu1  ;;  %2346 = vmatprep.mubr.bf16.mxu0 %v1451_v17 }
 0x1de   : > { %v1188_v23 = vadd.f32 %v2273_v22, %v2756_v40  ;;  %v1179_v24 = vpop.f32.mrb[47].mxu1  ;;  %2347 = vmatmul.mubr.bf16.gmra.mrb[40].mxu0 %v1452_v16  ;;  %v1397_v26 = vmax.f32 %v1185_v19, 0.0 }
 0x1df   : > { %v1180_v25 = vadd.f32 %v2756_v40, %v1179_v24  ;;  %v1395_v28 = vmax.f32 %v1177_v21, 0.0 }
 0x1e0   : > { %v1398_v27 = vmax.f32 %v1188_v23, 0.0 }
 0x1e1   : > { %v1396_v29 = vmax.f32 %v1180_v25, 0.0 }
 0x1e2   : > { %v1454_v30 = vpack.c.bf16 %v1398_v27, %v1397_v26 }
 0x1e3   : > { %v1453_v32 = vpack.c.bf16 %v1396_v29, %v1395_v28  ;;  %v2276_v33 = vpop.f32.mrb[48].mxu1 }
 0x1e4   : > { %v1201_v36 = vadd.f32 %v2276_v33, %v2756_v40  ;;  %v1192_v43 = vpop.f32.mrb[49].mxu1 }
 0x1e5   : > { %v1193_v38 = vadd.f32 %v2756_v40, %v1192_v43  ;;  %v2277_v39 = vpop.f32.mrb[50].mxu1  ;;  %2350 = vmatprep.mubr.bf16.mxu0 %v1453_v32 }
 0x1e6   : > { %v1204_v41 = vadd.f32 %v2277_v39, %v2756_v40  ;;  %v1195_v47 = vpop.f32.mrb[51].mxu1  ;;  %2351 = vmatmul.mubr.bf16.gmra.mrb[44].mxu0 %v1454_v30  ;;  %v1401_v9 = vmax.f32 %v1201_v36, 0.0 }
 0x1e7   : > { %v1196_v6 = vadd.f32 %v2756_v40, %v1195_v47  ;;  %v1399_v37 = vmax.f32 %v1193_v38, 0.0 }
 0x1e8   : > { %v1402_v34 = vmax.f32 %v1204_v41, 0.0 }
 0x1e9   : > { %v1400_v1 = vmax.f32 %v1196_v6, 0.0 }
 0x1ea   : > { %v1456_v4 = vpack.c.bf16 %v1402_v34, %v1401_v9 }
 0x1eb   : > { %v1455_v31 = vpack.c.bf16 %v1400_v1, %v1399_v37  ;;  %v2280_v35 = vpop.f32.mrb[52].mxu1 }
 0x1ec   : > { %v1217_v42 = vadd.f32 %v2280_v35, %v2756_v40  ;;  %v1208_v44 = vpop.f32.mrb[53].mxu1 }
 0x1ed   : > { %v1209_v45 = vadd.f32 %v2756_v40, %v1208_v44  ;;  %v2281_v46 = vpop.f32.mrb[54].mxu1  ;;  %2354 = vmatprep.mubr.bf16.mxu0 %v1455_v31 }
 0x1ee   : > { %v1220_v48 = vadd.f32 %v2281_v46, %v2756_v40  ;;  %v1211_v49 = vpop.f32.mrb[55].mxu1  ;;  %2355 = vmatmul.mubr.bf16.gmra.mrb[48].mxu0 %v1456_v4  ;;  %v1405_v51 = vmax.f32 %v1217_v42, 0.0 }
 0x1ef   : > { %v1212_v50 = vadd.f32 %v2756_v40, %v1211_v49  ;;  %v1403_v53 = vmax.f32 %v1209_v45, 0.0 }
 0x1f0   : > { %v1406_v52 = vmax.f32 %v1220_v48, 0.0 }
 0x1f1   : > { %v1404_v54 = vmax.f32 %v1212_v50, 0.0 }
 0x1f2   : > { %v1458_v55 = vpack.c.bf16 %v1406_v52, %v1405_v51 }
 0x1f3   : > { %v1457_v56 = vpack.c.bf16 %v1404_v54, %v1403_v53  ;;  %v2284_v57 = vpop.f32.mrb[56].mxu1 }
 0x1f4   : > { %v1233_v58 = vadd.f32 %v2284_v57, %v2756_v40  ;;  %v1224_v59 = vpop.f32.mrb[57].mxu1 }
 0x1f5   : > { %v1225_v60 = vadd.f32 %v2756_v40, %v1224_v59  ;;  %v2285_v61 = vpop.f32.mrb[58].mxu1  ;;  %2358 = vmatprep.mubr.bf16.mxu0 %v1457_v56 }
 0x1f6   : > { %v1236_v62 = vadd.f32 %v2285_v61, %v2756_v40  ;;  %v1227_v63 = vpop.f32.mrb[59].mxu1  ;;  %2359 = vmatmul.mubr.bf16.gmra.mrb[52].mxu0 %v1458_v55  ;;  %v1409_v2 = vmax.f32 %v1233_v58, 0.0 }
 0x1f7   : > { %v1228_v0 = vadd.f32 %v2756_v40, %v1227_v63  ;;  %v1407_v5 = vmax.f32 %v1225_v60, 0.0 }
 0x1f8   : > { %v1410_v3 = vmax.f32 %v1236_v62, 0.0 }
 0x1f9   : > { %v1408_v7 = vmax.f32 %v1228_v0, 0.0 }
 0x1fa   : > { %v1460_v8 = vpack.c.bf16 %v1410_v3, %v1409_v2 }
 0x1fb   : > { %v1459_v10 = vpack.c.bf16 %v1408_v7, %v1407_v5  ;;  %v2288_v11 = vpop.f32.mrb[60].mxu1 }
 0x1fc   : > { %v1249_v12 = vadd.f32 %v2288_v11, %v2756_v40  ;;  %v1240_v13 = vpop.f32.mrb[61].mxu1 }
 0x1fd   : > { %v1241_v14 = vadd.f32 %v2756_v40, %v1240_v13  ;;  %v2289_v15 = vpop.f32.mrb[62].mxu1  ;;  %2362 = vmatprep.mubr.bf16.mxu0 %v1459_v10 }
 0x1fe   : > { %v1252_v16 = vadd.f32 %v2289_v15, %v2756_v40  ;;  %v1243_v17 = vpop.f32.mrb[63].mxu1  ;;  %2363 = vmatmul.mubr.bf16.gmra.mrb[56].mxu0 %v1460_v8  ;;  %v1413_v19 = vmax.f32 %v1249_v12, 0.0 }
 0x1ff   : > { %v1244_v18 = vadd.f32 %v2756_v40, %v1243_v17  ;;  %v1411_v21 = vmax.f32 %v1241_v14, 0.0 }
 0x200   : > { %v1414_v20 = vmax.f32 %v1252_v16, 0.0 }
 0x201   : > { %v1412_v22 = vmax.f32 %v1244_v18, 0.0 }
 0x202   : > { %v1462_v23 = vpack.c.bf16 %v1414_v20, %v1413_v19 }
 0x203   : > { %v1461_v24 = vpack.c.bf16 %v1412_v22, %v1411_v21  ;;  %v2292_v25 = vpop.f32.mrb[64].mxu1 }
 0x204   : > { %v1265_v26 = vadd.f32 %v2292_v25, %v2756_v40  ;;  %v1256_v27 = vpop.f32.mrb[65].mxu1 }
 0x205   : > { %v1257_v28 = vadd.f32 %v2756_v40, %v1256_v27  ;;  %v2293_v29 = vpop.f32.mrb[66].mxu1  ;;  %2366 = vmatprep.mubr.bf16.mxu0 %v1461_v24 }
 0x206   : > { %v1268_v30 = vadd.f32 %v2293_v29, %v2756_v40  ;;  %v1259_v32 = vpop.f32.mrb[67].mxu1  ;;  %2367 = vmatmul.mubr.bf16.gmra.mrb[60].mxu0 %v1462_v23  ;;  %v1417_v36 = vmax.f32 %v1265_v26, 0.0 }
 0x207   : > { %v1260_v33 = vadd.f32 %v2756_v40, %v1259_v32  ;;  %v1415_v38 = vmax.f32 %v1257_v28, 0.0 }
 0x208   : > { %v1418_v43 = vmax.f32 %v1268_v30, 0.0 }
 0x209   : > { %v1416_v39 = vmax.f32 %v1260_v33, 0.0 }
 0x20a   : > { %v1464_v41 = vpack.c.bf16 %v1418_v43, %v1417_v36 }
 0x20b   : > { %v1463_v47 = vpack.c.bf16 %v1416_v39, %v1415_v38  ;;  %v2296_v6 = vpop.f32.mrb[68].mxu1 }
 0x20c   : > { %v1281_v9 = vadd.f32 %v2296_v6, %v2756_v40  ;;  %v1272_v34 = vpop.f32.mrb[69].mxu1 }
 0x20d   : > { %v1273_v37 = vadd.f32 %v2756_v40, %v1272_v34  ;;  %v2297_v1 = vpop.f32.mrb[70].mxu1  ;;  %2370 = vmatprep.mubr.bf16.mxu0 %v1463_v47 }
 0x20e   : > { %v1284_v4 = vadd.f32 %v2297_v1, %v2756_v40  ;;  %v1275_v31 = vpop.f32.mrb[71].mxu1  ;;  %2371 = vmatmul.mubr.bf16.gmra.mrb[64].mxu0 %v1464_v41  ;;  %v1421_v42 = vmax.f32 %v1281_v9, 0.0 }
 0x20f   : > { %v1276_v35 = vadd.f32 %v2756_v40, %v1275_v31  ;;  %v1419_v45 = vmax.f32 %v1273_v37, 0.0 }
 0x210   : > { %v1422_v44 = vmax.f32 %v1284_v4, 0.0 }
 0x211   : > { %v1420_v46 = vmax.f32 %v1276_v35, 0.0 }
 0x212   : > { %v1466_v48 = vpack.c.bf16 %v1422_v44, %v1421_v42 }
 0x213   : > { %v1465_v49 = vpack.c.bf16 %v1420_v46, %v1419_v45  ;;  %v2300_v50 = vpop.f32.mrb[72].mxu1 }
 0x214   : > { %v1297_v51 = vadd.f32 %v2300_v50, %v2756_v40  ;;  %v1288_v52 = vpop.f32.mrb[73].mxu1 }
 0x215   : > { %v1289_v53 = vadd.f32 %v2756_v40, %v1288_v52  ;;  %v2301_v54 = vpop.f32.mrb[74].mxu1  ;;  %2374 = vmatprep.mubr.bf16.mxu0 %v1465_v49 }
 0x216   : > { %v1300_v55 = vadd.f32 %v2301_v54, %v2756_v40  ;;  %v1291_v56 = vpop.f32.mrb[75].mxu1  ;;  %2375 = vmatmul.mubr.bf16.gmra.mrb[68].mxu0 %v1466_v48  ;;  %v1425_v58 = vmax.f32 %v1297_v51, 0.0 }
 0x217   : > { %v1292_v57 = vadd.f32 %v2756_v40, %v1291_v56  ;;  %v1423_v60 = vmax.f32 %v1289_v53, 0.0 }
 0x218   : > { %v1426_v59 = vmax.f32 %v1300_v55, 0.0 }
 0x219   : > { %v1424_v61 = vmax.f32 %v1292_v57, 0.0 }
 0x21a   : > { %v1468_v62 = vpack.c.bf16 %v1426_v59, %v1425_v58 }
 0x21b   : > { %v1467_v63 = vpack.c.bf16 %v1424_v61, %v1423_v60  ;;  %v2304_v0 = vpop.f32.mrb[76].mxu1 }
 0x21c   : > { %v1313_v2 = vadd.f32 %v2304_v0, %v2756_v40  ;;  %v1304_v3 = vpop.f32.mrb[77].mxu1 }
 0x21d   : > { %v1305_v5 = vadd.f32 %v2756_v40, %v1304_v3  ;;  %v2305_v7 = vpop.f32.mrb[78].mxu1  ;;  %2378 = vmatprep.mubr.bf16.mxu0 %v1467_v63 }
 0x21e   : > { %v1316_v8 = vadd.f32 %v2305_v7, %v2756_v40  ;;  %v1307_v10 = vpop.f32.mrb[79].mxu1  ;;  %2379 = vmatmul.mubr.bf16.gmra.mrb[72].mxu0 %v1468_v62  ;;  %v1429_v12 = vmax.f32 %v1313_v2, 0.0 }
 0x21f   : > { %v1308_v11 = vadd.f32 %v2756_v40, %v1307_v10  ;;  %v1427_v14 = vmax.f32 %v1305_v5, 0.0 }
 0x220   : > { %v1430_v13 = vmax.f32 %v1316_v8, 0.0 }
 0x221   : > { %v1428_v15 = vmax.f32 %v1308_v11, 0.0  ;;  %v2826_v11 = vld [vmem:[%s3034_s6] ss:$0 sm:$0xff] }
 0x222   : > { %v1470_v16 = vpack.c.bf16 %v1430_v13, %v1429_v12 }
 0x223   : > { %v1469_v17 = vpack.c.bf16 %v1428_v15, %v1427_v14  ;;  %v2308_v18 = vpop.f32.mrb[80].mxu1 }
 0x224   : > { %v1329_v19 = vadd.f32 %v2308_v18, %v2756_v40  ;;  %v1320_v20 = vpop.f32.mrb[81].mxu1 }
 0x225   : > { %v1321_v21 = vadd.f32 %v2756_v40, %v1320_v20  ;;  %v2309_v22 = vpop.f32.mrb[82].mxu1  ;;  %2382 = vmatprep.mubr.bf16.mxu0 %v1469_v17 }
 0x226   : > { %v1332_v23 = vadd.f32 %v2309_v22, %v2756_v40  ;;  %v1323_v24 = vpop.f32.mrb[83].mxu1  ;;  %2383 = vmatmul.mubr.bf16.gmra.mrb[76].mxu0 %v1470_v16  ;;  %v1433_v26 = vmax.f32 %v1329_v19, 0.0 }
 0x227   : > { %v1324_v25 = vadd.f32 %v2756_v40, %v1323_v24  ;;  %v1431_v28 = vmax.f32 %v1321_v21, 0.0 }
 0x228   : > { %v1434_v27 = vmax.f32 %v1332_v23, 0.0 }
 0x229   : > { %v1432_v29 = vmax.f32 %v1324_v25, 0.0 }
 0x22a   : > { %v1472_v30 = vpack.c.bf16 %v1434_v27, %v1433_v26 }
 0x22b   : > { %v1471_v32 = vpack.c.bf16 %v1432_v29, %v1431_v28  ;;  %v2312_v33 = vpop.f32.mrb[84].mxu1 }
 0x22c   : > { %v1345_v36 = vadd.f32 %v2312_v33, %v2756_v40  ;;  %v1336_v43 = vpop.f32.mrb[85].mxu1 }
 0x22d   : > { %v1337_v38 = vadd.f32 %v2756_v40, %v1336_v43  ;;  %v2313_v39 = vpop.f32.mrb[86].mxu1  ;;  %2386 = vmatprep.mubr.bf16.mxu0 %v1471_v32 }
 0x22e   : > { %v1348_v41 = vadd.f32 %v2313_v39, %v2756_v40  ;;  %v1339_v47 = vpop.f32.mrb[87].mxu1  ;;  %2387 = vmatmul.mubr.bf16.gmra.mrb[80].mxu0 %v1472_v30  ;;  %v1437_v9 = vmax.f32 %v1345_v36, 0.0 }
 0x22f   : > { %v1340_v6 = vadd.f32 %v2756_v40, %v1339_v47  ;;  %v1435_v37 = vmax.f32 %v1337_v38, 0.0 }
 0x230   : > { %v1438_v34 = vmax.f32 %v1348_v41, 0.0 }
 0x231   : > { %v1436_v1 = vmax.f32 %v1340_v6, 0.0 }
 0x232   : > { %v1474_v4 = vpack.c.bf16 %v1438_v34, %v1437_v9 }
 0x233   : > { %v1473_v31 = vpack.c.bf16 %v1436_v1, %v1435_v37  ;;  %v2316_v35 = vpop.f32.mrb[88].mxu1 }
 0x234   : > { %v1361_v42 = vadd.f32 %v2316_v35, %v2756_v40  ;;  %v1352_v44 = vpop.f32.mrb[89].mxu1 }
 0x235   : > { %v1353_v45 = vadd.f32 %v2756_v40, %v1352_v44  ;;  %v2317_v46 = vpop.f32.mrb[90].mxu1  ;;  %2390 = vmatprep.mubr.bf16.mxu0 %v1473_v31 }
 0x236   : > { %v1364_v48 = vadd.f32 %v2317_v46, %v2756_v40  ;;  %v1355_v49 = vpop.f32.mrb[91].mxu1  ;;  %2391 = vmatmul.mubr.bf16.gmra.mrb[84].mxu0 %v1474_v4  ;;  %v1441_v51 = vmax.f32 %v1361_v42, 0.0 }
 0x237   : > { %v1356_v50 = vadd.f32 %v2756_v40, %v1355_v49  ;;  %v1439_v53 = vmax.f32 %v1353_v45, 0.0 }
 0x238   : > { %v1442_v52 = vmax.f32 %v1364_v48, 0.0 }
 0x239   : > { %v1440_v54 = vmax.f32 %v1356_v50, 0.0 }
 0x23a   : > { %v1476_v55 = vpack.c.bf16 %v1442_v52, %v1441_v51 }
 0x23b   : > { %v1475_v56 = vpack.c.bf16 %v1440_v54, %v1439_v53  ;;  %v2320_v57 = vpop.f32.mrb[92].mxu1 }
 0x23c   : > { %v1377_v58 = vadd.f32 %v2320_v57, %v2756_v40  ;;  %v1368_v59 = vpop.f32.mrb[93].mxu1 }
 0x23d   : > { %v1369_v60 = vadd.f32 %v2756_v40, %v1368_v59  ;;  %v2321_v61 = vpop.f32.mrb[94].mxu1  ;;  %2394 = vmatprep.mubr.bf16.mxu0 %v1475_v56 }
 0x23e   : > { %v1380_v62 = vadd.f32 %v2321_v61, %v2756_v40  ;;  %v1371_v63 = vpop.f32.mrb[95].mxu1  ;;  %2395 = vmatmul.mubr.bf16.gmra.mrb[88].mxu0 %v1476_v55  ;;  %v1445_v2 = vmax.f32 %v1377_v58, 0.0 }
 0x23f   : > { %v1372_v0 = vadd.f32 %v2756_v40, %v1371_v63  ;;  %v1443_v5 = vmax.f32 %v1369_v60, 0.0 }
 0x240   : > { %v1446_v3 = vmax.f32 %v1380_v62, 0.0 }
 0x241   : > { %v1444_v7 = vmax.f32 %v1372_v0, 0.0 }
 0x242   : > { %v1478_v8 = vpack.c.bf16 %v1446_v3, %v1445_v2 }
 0x243   : > { %v1477_v10 = vpack.c.bf16 %v1444_v7, %v1443_v5 }
 0x245   : > { %2398 = vmatprep.mubr.bf16.mxu0 %v1477_v10 }
 0x246   : > { %2399 = vmatmul.mubr.bf16.gmra.mrb[92].mxu0 %v1478_v8 }
 0x2a1   : > { %v2340_v40 = vpop.f32.mrb[32].mxu0 }
 0x2a2   : > { %v1593_v12 = vadd.f32 %v2340_v40, %v2826_v11  ;;  %v1584_v13 = vpop.f32.mrb[33].mxu0 }
 0x2a3   : > { %v1585_v14 = vadd.f32 %v2826_v11, %v1584_v13  ;;  %v2341_v15 = vpop.f32.mrb[34].mxu0 }
 0x2a4   : > { %1842 = vst.msk [vmem:[%s2831_s13 + $0x10] sm:$0xff] %vm1839_vm3, %v1593_v12  ;;  %v1596_v16 = vadd.f32 %v2341_v15, %v2826_v11  ;;  %v1587_v17 = vpop.f32.mrb[35].mxu0 }
 0x2a5   : > { %1840 = vst.msk [vmem:[%s2831_s13] sm:$0xff] %vm1839_vm3, %v1585_v14  ;;  %v1588_v18 = vadd.f32 %v2826_v11, %v1587_v17 }
 0x2a6   : > { %1843 = vst.msk [vmem:[%s2831_s13 + $0x18] sm:$0xff] %vm1839_vm3, %v1596_v16 }
 0x2a7   : > { %1841 = vst.msk [vmem:[%s2831_s13 + $0x8] sm:$0xff] %vm1839_vm3, %v1588_v18 }
 0x2a9   : > { %v2344_v19 = vpop.f32.mrb[36].mxu0 }
 0x2aa   : > { %v1609_v20 = vadd.f32 %v2344_v19, %v2826_v11  ;;  %v1600_v21 = vpop.f32.mrb[37].mxu0 }
 0x2ab   : > { %v1601_v22 = vadd.f32 %v2826_v11, %v1600_v21  ;;  %v2345_v23 = vpop.f32.mrb[38].mxu0 }
 0x2ac   : > { %1846 = vst.msk [vmem:[%s2831_s13 + $0x30] sm:$0xff] %vm1839_vm3, %v1609_v20  ;;  %v1612_v24 = vadd.f32 %v2345_v23, %v2826_v11  ;;  %v1603_v25 = vpop.f32.mrb[39].mxu0 }
 0x2ad   : > { %1844 = vst.msk [vmem:[%s2831_s13 + $0x20] sm:$0xff] %vm1839_vm3, %v1601_v22  ;;  %v1604_v26 = vadd.f32 %v2826_v11, %v1603_v25 }
 0x2ae   : > { %1847 = vst.msk [vmem:[%s2831_s13 + $0x38] sm:$0xff] %vm1839_vm3, %v1612_v24 }
 0x2af   : > { %1845 = vst.msk [vmem:[%s2831_s13 + $0x28] sm:$0xff] %vm1839_vm3, %v1604_v26 }
 0x2b1   : > { %v2348_v27 = vpop.f32.mrb[40].mxu0 }
 0x2b2   : > { %v1625_v28 = vadd.f32 %v2348_v27, %v2826_v11  ;;  %v1616_v29 = vpop.f32.mrb[41].mxu0 }
 0x2b3   : > { %v1617_v30 = vadd.f32 %v2826_v11, %v1616_v29  ;;  %v2349_v32 = vpop.f32.mrb[42].mxu0 }
 0x2b4   : > { %1850 = vst.msk [vmem:[%s2831_s13 + $0x50] sm:$0xff] %vm1839_vm3, %v1625_v28  ;;  %v1628_v33 = vadd.f32 %v2349_v32, %v2826_v11  ;;  %v1619_v36 = vpop.f32.mrb[43].mxu0 }
 0x2b5   : > { %1848 = vst.msk [vmem:[%s2831_s13 + $0x40] sm:$0xff] %vm1839_vm3, %v1617_v30  ;;  %v1620_v43 = vadd.f32 %v2826_v11, %v1619_v36 }
 0x2b6   : > { %1851 = vst.msk [vmem:[%s2831_s13 + $0x58] sm:$0xff] %vm1839_vm3, %v1628_v33 }
 0x2b7   : > { %1849 = vst.msk [vmem:[%s2831_s13 + $0x48] sm:$0xff] %vm1839_vm3, %v1620_v43 }
 0x2b9   : > { %v2352_v38 = vpop.f32.mrb[44].mxu0 }
 0x2ba   : > { %v1641_v39 = vadd.f32 %v2352_v38, %v2826_v11  ;;  %v1632_v41 = vpop.f32.mrb[45].mxu0 }
 0x2bb   : > { %v1633_v47 = vadd.f32 %v2826_v11, %v1632_v41  ;;  %v2353_v6 = vpop.f32.mrb[46].mxu0 }
 0x2bc   : > { %1854 = vst.msk [vmem:[%s2831_s13 + $0x70] sm:$0xff] %vm1839_vm3, %v1641_v39  ;;  %v1644_v9 = vadd.f32 %v2353_v6, %v2826_v11  ;;  %v1635_v34 = vpop.f32.mrb[47].mxu0 }
 0x2bd   : > { %1852 = vst.msk [vmem:[%s2831_s13 + $0x60] sm:$0xff] %vm1839_vm3, %v1633_v47  ;;  %v1636_v37 = vadd.f32 %v2826_v11, %v1635_v34 }
 0x2be   : > { %1855 = vst.msk [vmem:[%s2831_s13 + $0x78] sm:$0xff] %vm1839_vm3, %v1644_v9 }
 0x2bf   : > { %1853 = vst.msk [vmem:[%s2831_s13 + $0x68] sm:$0xff] %vm1839_vm3, %v1636_v37 }
 0x2c1   : > { %v2356_v1 = vpop.f32.mrb[48].mxu0 }
 0x2c2   : > { %v1657_v4 = vadd.f32 %v2356_v1, %v2826_v11  ;;  %v1648_v31 = vpop.f32.mrb[49].mxu0 }
 0x2c3   : > { %v1649_v35 = vadd.f32 %v2826_v11, %v1648_v31  ;;  %v2357_v42 = vpop.f32.mrb[50].mxu0 }
 0x2c4   : > { %1858 = vst.msk [vmem:[%s2831_s13 + $0x90] sm:$0xff] %vm1839_vm3, %v1657_v4  ;;  %v1660_v44 = vadd.f32 %v2357_v42, %v2826_v11  ;;  %v1651_v45 = vpop.f32.mrb[51].mxu0 }
 0x2c5   : > { %1856 = vst.msk [vmem:[%s2831_s13 + $0x80] sm:$0xff] %vm1839_vm3, %v1649_v35  ;;  %v1652_v46 = vadd.f32 %v2826_v11, %v1651_v45 }
 0x2c6   : > { %1859 = vst.msk [vmem:[%s2831_s13 + $0x98] sm:$0xff] %vm1839_vm3, %v1660_v44 }
 0x2c7   : > { %1857 = vst.msk [vmem:[%s2831_s13 + $0x88] sm:$0xff] %vm1839_vm3, %v1652_v46 }
 0x2c9   : > { %v2360_v48 = vpop.f32.mrb[52].mxu0 }
 0x2ca   : > { %v1673_v49 = vadd.f32 %v2360_v48, %v2826_v11  ;;  %v1664_v50 = vpop.f32.mrb[53].mxu0 }
 0x2cb   : > { %v1665_v51 = vadd.f32 %v2826_v11, %v1664_v50  ;;  %v2361_v52 = vpop.f32.mrb[54].mxu0 }
 0x2cc   : > { %1862 = vst.msk [vmem:[%s2831_s13 + $0xb0] sm:$0xff] %vm1839_vm3, %v1673_v49  ;;  %v1676_v53 = vadd.f32 %v2361_v52, %v2826_v11  ;;  %v1667_v54 = vpop.f32.mrb[55].mxu0 }
 0x2cd   : > { %1860 = vst.msk [vmem:[%s2831_s13 + $0xa0] sm:$0xff] %vm1839_vm3, %v1665_v51  ;;  %v1668_v55 = vadd.f32 %v2826_v11, %v1667_v54 }
 0x2ce   : > { %1863 = vst.msk [vmem:[%s2831_s13 + $0xb8] sm:$0xff] %vm1839_vm3, %v1676_v53 }
 0x2cf   : > { %1861 = vst.msk [vmem:[%s2831_s13 + $0xa8] sm:$0xff] %vm1839_vm3, %v1668_v55 }
 0x2d1   : > { %v2364_v56 = vpop.f32.mrb[56].mxu0 }
 0x2d2   : > { %v1689_v57 = vadd.f32 %v2364_v56, %v2826_v11  ;;  %v1680_v58 = vpop.f32.mrb[57].mxu0 }
 0x2d3   : > { %v1681_v59 = vadd.f32 %v2826_v11, %v1680_v58  ;;  %v2365_v60 = vpop.f32.mrb[58].mxu0 }
 0x2d4   : > { %1866 = vst.msk [vmem:[%s2831_s13 + $0xd0] sm:$0xff] %vm1839_vm3, %v1689_v57  ;;  %v1692_v61 = vadd.f32 %v2365_v60, %v2826_v11  ;;  %v1683_v62 = vpop.f32.mrb[59].mxu0 }
 0x2d5   : > { %1864 = vst.msk [vmem:[%s2831_s13 + $0xc0] sm:$0xff] %vm1839_vm3, %v1681_v59  ;;  %v1684_v63 = vadd.f32 %v2826_v11, %v1683_v62 }
 0x2d6   : > { %1867 = vst.msk [vmem:[%s2831_s13 + $0xd8] sm:$0xff] %vm1839_vm3, %v1692_v61 }
 0x2d7   : > { %1865 = vst.msk [vmem:[%s2831_s13 + $0xc8] sm:$0xff] %vm1839_vm3, %v1684_v63 }
 0x2d9   : > { %v2368_v0 = vpop.f32.mrb[60].mxu0 }
 0x2da   : > { %v1705_v2 = vadd.f32 %v2368_v0, %v2826_v11  ;;  %v1696_v3 = vpop.f32.mrb[61].mxu0 }
 0x2db   : > { %v1697_v5 = vadd.f32 %v2826_v11, %v1696_v3  ;;  %v2369_v7 = vpop.f32.mrb[62].mxu0 }
 0x2dc   : > { %1870 = vst.msk [vmem:[%s2831_s13 + $0xf0] sm:$0xff] %vm1839_vm3, %v1705_v2  ;;  %v1708_v8 = vadd.f32 %v2369_v7, %v2826_v11  ;;  %v1699_v10 = vpop.f32.mrb[63].mxu0 }
 0x2dd   : > { %1868 = vst.msk [vmem:[%s2831_s13 + $0xe0] sm:$0xff] %vm1839_vm3, %v1697_v5  ;;  %v1700_v40 = vadd.f32 %v2826_v11, %v1699_v10 }
 0x2de   : > { %1871 = vst.msk [vmem:[%s2831_s13 + $0xf8] sm:$0xff] %vm1839_vm3, %v1708_v8 }
 0x2df   : > { %1869 = vst.msk [vmem:[%s2831_s13 + $0xe8] sm:$0xff] %vm1839_vm3, %v1700_v40 }
 0x2e1   : > { %v2372_v12 = vpop.f32.mrb[64].mxu0 }
 0x2e2   : > { %v1721_v13 = vadd.f32 %v2372_v12, %v2826_v11  ;;  %v1712_v14 = vpop.f32.mrb[65].mxu0 }
 0x2e3   : > { %v1713_v15 = vadd.f32 %v2826_v11, %v1712_v14  ;;  %v2373_v16 = vpop.f32.mrb[66].mxu0 }
 0x2e4   : > { %1874 = vst.msk [vmem:[%s2831_s13 + $0x110] sm:$0xff] %vm1839_vm3, %v1721_v13  ;;  %v1724_v17 = vadd.f32 %v2373_v16, %v2826_v11  ;;  %v1715_v18 = vpop.f32.mrb[67].mxu0 }
 0x2e5   : > { %1872 = vst.msk [vmem:[%s2831_s13 + $0x100] sm:$0xff] %vm1839_vm3, %v1713_v15  ;;  %v1716_v19 = vadd.f32 %v2826_v11, %v1715_v18 }
 0x2e6   : > { %1875 = vst.msk [vmem:[%s2831_s13 + $0x118] sm:$0xff] %vm1839_vm3, %v1724_v17 }
 0x2e7   : > { %1873 = vst.msk [vmem:[%s2831_s13 + $0x108] sm:$0xff] %vm1839_vm3, %v1716_v19 }
 0x2e9   : > { %v2376_v20 = vpop.f32.mrb[68].mxu0 }
 0x2ea   : > { %v1737_v21 = vadd.f32 %v2376_v20, %v2826_v11  ;;  %v1728_v22 = vpop.f32.mrb[69].mxu0 }
 0x2eb   : > { %v1729_v23 = vadd.f32 %v2826_v11, %v1728_v22  ;;  %v2377_v24 = vpop.f32.mrb[70].mxu0 }
 0x2ec   : > { %1878 = vst.msk [vmem:[%s2831_s13 + $0x130] sm:$0xff] %vm1839_vm3, %v1737_v21  ;;  %v1740_v25 = vadd.f32 %v2377_v24, %v2826_v11  ;;  %v1731_v26 = vpop.f32.mrb[71].mxu0 }
 0x2ed   : > { %1876 = vst.msk [vmem:[%s2831_s13 + $0x120] sm:$0xff] %vm1839_vm3, %v1729_v23  ;;  %v1732_v27 = vadd.f32 %v2826_v11, %v1731_v26 }
 0x2ee   : > { %1879 = vst.msk [vmem:[%s2831_s13 + $0x138] sm:$0xff] %vm1839_vm3, %v1740_v25 }
 0x2ef   : > { %1877 = vst.msk [vmem:[%s2831_s13 + $0x128] sm:$0xff] %vm1839_vm3, %v1732_v27 }
 0x2f1   : > { %v2380_v28 = vpop.f32.mrb[72].mxu0 }
 0x2f2   : > { %v1753_v29 = vadd.f32 %v2380_v28, %v2826_v11  ;;  %v1744_v30 = vpop.f32.mrb[73].mxu0 }
 0x2f3   : > { %v1745_v32 = vadd.f32 %v2826_v11, %v1744_v30  ;;  %v2381_v33 = vpop.f32.mrb[74].mxu0 }
 0x2f4   : > { %1882 = vst.msk [vmem:[%s2831_s13 + $0x150] sm:$0xff] %vm1839_vm3, %v1753_v29  ;;  %v1756_v36 = vadd.f32 %v2381_v33, %v2826_v11  ;;  %v1747_v43 = vpop.f32.mrb[75].mxu0 }
 0x2f5   : > { %1880 = vst.msk [vmem:[%s2831_s13 + $0x140] sm:$0xff] %vm1839_vm3, %v1745_v32  ;;  %v1748_v38 = vadd.f32 %v2826_v11, %v1747_v43 }
 0x2f6   : > { %1883 = vst.msk [vmem:[%s2831_s13 + $0x158] sm:$0xff] %vm1839_vm3, %v1756_v36 }
 0x2f7   : > { %1881 = vst.msk [vmem:[%s2831_s13 + $0x148] sm:$0xff] %vm1839_vm3, %v1748_v38 }
 0x2f9   : > { %v2384_v39 = vpop.f32.mrb[76].mxu0 }
 0x2fa   : > { %v1769_v41 = vadd.f32 %v2384_v39, %v2826_v11  ;;  %v1760_v47 = vpop.f32.mrb[77].mxu0 }
 0x2fb   : > { %v1761_v6 = vadd.f32 %v2826_v11, %v1760_v47  ;;  %v2385_v9 = vpop.f32.mrb[78].mxu0 }
 0x2fc   : > { %1886 = vst.msk [vmem:[%s2831_s13 + $0x170] sm:$0xff] %vm1839_vm3, %v1769_v41  ;;  %v1772_v34 = vadd.f32 %v2385_v9, %v2826_v11  ;;  %v1763_v37 = vpop.f32.mrb[79].mxu0 }
 0x2fd   : > { %1884 = vst.msk [vmem:[%s2831_s13 + $0x160] sm:$0xff] %vm1839_vm3, %v1761_v6  ;;  %v1764_v1 = vadd.f32 %v2826_v11, %v1763_v37 }
 0x2fe   : > { %1887 = vst.msk [vmem:[%s2831_s13 + $0x178] sm:$0xff] %vm1839_vm3, %v1772_v34 }
 0x2ff   : > { %1885 = vst.msk [vmem:[%s2831_s13 + $0x168] sm:$0xff] %vm1839_vm3, %v1764_v1 }
 0x301   : > { %v2388_v4 = vpop.f32.mrb[80].mxu0 }
 0x302   : > { %v1785_v31 = vadd.f32 %v2388_v4, %v2826_v11  ;;  %v1776_v35 = vpop.f32.mrb[81].mxu0 }
 0x303   : > { %v1777_v42 = vadd.f32 %v2826_v11, %v1776_v35  ;;  %v2389_v44 = vpop.f32.mrb[82].mxu0 }
 0x304   : > { %1890 = vst.msk [vmem:[%s2831_s13 + $0x190] sm:$0xff] %vm1839_vm3, %v1785_v31  ;;  %v1788_v45 = vadd.f32 %v2389_v44, %v2826_v11  ;;  %v1779_v46 = vpop.f32.mrb[83].mxu0 }
 0x305   : > { %1888 = vst.msk [vmem:[%s2831_s13 + $0x180] sm:$0xff] %vm1839_vm3, %v1777_v42  ;;  %v1780_v48 = vadd.f32 %v2826_v11, %v1779_v46 }
 0x306   : > { %1891 = vst.msk [vmem:[%s2831_s13 + $0x198] sm:$0xff] %vm1839_vm3, %v1788_v45 }
 0x307   : > { %1889 = vst.msk [vmem:[%s2831_s13 + $0x188] sm:$0xff] %vm1839_vm3, %v1780_v48 }
 0x309   : > { %v2392_v49 = vpop.f32.mrb[84].mxu0 }
 0x30a   : > { %v1801_v50 = vadd.f32 %v2392_v49, %v2826_v11  ;;  %v1792_v51 = vpop.f32.mrb[85].mxu0 }
 0x30b   : > { %v1793_v52 = vadd.f32 %v2826_v11, %v1792_v51  ;;  %v2393_v53 = vpop.f32.mrb[86].mxu0 }
 0x30c   : > { %1894 = vst.msk [vmem:[%s2831_s13 + $0x1b0] sm:$0xff] %vm1839_vm3, %v1801_v50  ;;  %v1804_v54 = vadd.f32 %v2393_v53, %v2826_v11  ;;  %v1795_v55 = vpop.f32.mrb[87].mxu0 }
 0x30d   : > { %1892 = vst.msk [vmem:[%s2831_s13 + $0x1a0] sm:$0xff] %vm1839_vm3, %v1793_v52  ;;  %v1796_v56 = vadd.f32 %v2826_v11, %v1795_v55 }
 0x30e   : > { %1895 = vst.msk [vmem:[%s2831_s13 + $0x1b8] sm:$0xff] %vm1839_vm3, %v1804_v54 }
 0x30f   : > { %1893 = vst.msk [vmem:[%s2831_s13 + $0x1a8] sm:$0xff] %vm1839_vm3, %v1796_v56 }
 0x311   : > { %v2396_v57 = vpop.f32.mrb[88].mxu0 }
 0x312   : > { %v1817_v58 = vadd.f32 %v2396_v57, %v2826_v11  ;;  %v1808_v59 = vpop.f32.mrb[89].mxu0 }
 0x313   : > { %v1809_v60 = vadd.f32 %v2826_v11, %v1808_v59  ;;  %v2397_v61 = vpop.f32.mrb[90].mxu0 }
 0x314   : > { %1898 = vst.msk [vmem:[%s2831_s13 + $0x1d0] sm:$0xff] %vm1839_vm3, %v1817_v58  ;;  %v1820_v62 = vadd.f32 %v2397_v61, %v2826_v11  ;;  %v1811_v63 = vpop.f32.mrb[91].mxu0 }
 0x315   : > { %1896 = vst.msk [vmem:[%s2831_s13 + $0x1c0] sm:$0xff] %vm1839_vm3, %v1809_v60  ;;  %v1812_v0 = vadd.f32 %v2826_v11, %v1811_v63 }
 0x316   : > { %1899 = vst.msk [vmem:[%s2831_s13 + $0x1d8] sm:$0xff] %vm1839_vm3, %v1820_v62 }
 0x317   : > { %1897 = vst.msk [vmem:[%s2831_s13 + $0x1c8] sm:$0xff] %vm1839_vm3, %v1812_v0 }
 0x319   : > { %v2400_v2 = vpop.f32.mrb[92].mxu0 }
 0x31a   : > { %v1833_v3 = vadd.f32 %v2400_v2, %v2826_v11  ;;  %v1824_v5 = vpop.f32.mrb[93].mxu0 }
 0x31b   : > { %v1825_v7 = vadd.f32 %v2826_v11, %v1824_v5  ;;  %v2401_v8 = vpop.f32.mrb[94].mxu0 }
 0x31c   : > { %1902 = vst.msk [vmem:[%s2831_s13 + $0x1f0] sm:$0xff] %vm1839_vm3, %v1833_v3  ;;  %v1836_v10 = vadd.f32 %v2401_v8, %v2826_v11  ;;  %v1827_v40 = vpop.f32.mrb[95].mxu0 }
 0x31d   : > { %1900 = vst.msk [vmem:[%s2831_s13 + $0x1e0] sm:$0xff] %vm1839_vm3, %v1825_v7  ;;  %v1828_v12 = vadd.f32 %v2826_v11, %v1827_v40 }
 0x31e   : > { %1903 = vst.msk [vmem:[%s2831_s13 + $0x1f8] sm:$0xff] %vm1839_vm3, %v1836_v10 }
 0x31f   : > { %1901 = vst.msk [vmem:[%s2831_s13 + $0x1e8] sm:$0xff] %vm1839_vm3, %v1828_v12 }
 0x320 PF: > { %s17_s24 = sadd.s32 1, %s2474_s24  }
 0x321   : > { %p14_p4 = scmp.ge.s32.totalorder %s17_s24, 4  }
 0x323   :  { %16 = sbr.rel (!%p14_p4) target bundleno = 1 (0x1), region = 78 }

</bundles_post_ra>
